<compile_context>
chip_gen: v6e
topology: v6e:2x2x1
jax: 0.10.0
libtpu: 0.0.40
codegen_flags: <defaults>
</compile_context>

<pallas_src>
import numpy as np
import jax
import jax.numpy as jnp
from jax.experimental import pallas as pl
from jax.experimental.pallas import tpu as pltpu

_EPS = 1e-5
_VMEM = pl.BlockSpec(memory_space=pltpu.MemorySpace.VMEM)


# ---------------------------------------------------------------------------
# One-time host-side constant builders (numpy; no per-call tracing cost).
# ---------------------------------------------------------------------------

class _Slab:
    """Row-packed 2-D constant slab -> one HBM->VMEM DMA per slab."""

    def __init__(self, width, dtype, row_align):
        self.width, self.dtype, self.align = width, dtype, row_align
        self.blocks, self.off = [], 0

    def add(self, arr):
        arr = np.asarray(arr, np.float32)
        r, c = arr.shape
        assert c <= self.width
        rpad = -(-r // self.align) * self.align          # aligned block starts
        blk = np.zeros((rpad, self.width), np.float32)
        blk[:r, :c] = arr
        off = self.off
        self.blocks.append(blk)
        self.off += rpad
        return off

    def finalize(self):
        if not self.blocks:
            self.blocks.append(np.zeros((self.align, self.width), np.float32))
        return jnp.asarray(np.concatenate(self.blocks, 0), dtype=self.dtype)


def _rp_taps(n_img, h_in, k, pad0, pad1, s):
    """Per-tap row-placement selectors stacked on rows: (k*N*Ho, N*H_in).

    Tap i block is block-diagonal over images; RP_i @ act yields, for every
    output row ho, the (H-padded / H-dilated) input row ho+i."""
    hd = (h_in - 1) * s + 1
    hp = hd + pad0 + pad1
    ho = hp - k + 1
    rp = np.zeros((hp, h_in), np.float32)
    rp[pad0 + s * np.arange(h_in), np.arange(h_in)] = 1.0
    out = np.zeros((k * n_img * ho, n_img * h_in), np.float32)
    for i in range(k):
        for n in range(n_img):
            out[i * n_img * ho + n * ho:i * n_img * ho + (n + 1) * ho,
                n * h_in:(n + 1) * h_in] = rp[i:i + ho, :]
    return out, ho


def _toeplitz(w_conv, w_in, pad0, pad1, s):
    """Per-tap W-axis Toeplitz weights stacked on rows: (k*W_in*C, Wo*O).

    Folds W-padding, W-dilation (transposed conv) and all kw taps into one
    matrix so the conv is a single matmul in the (rows=H, cols=W*C) layout."""
    o_sz, c_sz, kh, kw = w_conv.shape
    wd = (w_in - 1) * s + 1
    wp = wd + pad0 + pad1
    wo = wp - kw + 1
    wflat = w_conv.reshape(-1)
    w_i = np.arange(w_in)[:, None, None, None]
    c = np.arange(c_sz)[None, :, None, None]
    w_o = np.arange(wo)[None, None, :, None]
    o = np.arange(o_sz)[None, None, None, :]
    taps = []
    for i in range(kh):
        j = pad0 + s * w_i - w_o                         # required kw offset
        valid = (j >= 0) & (j < kw)
        jc = np.clip(j, 0, kw - 1)
        flat = ((o * c_sz + c) * kh + i) * kw + jc       # index into w_conv.flat
        tb = wflat[flat] * valid
        taps.append(tb.reshape(w_in * c_sz, wo * o_sz))
    return np.concatenate(taps, 0), wo


def _pool_mats(n_img, ho, wo, c):
    """MaxPool2d(2,2) selectors: even|odd rows stacked (2*N*H2, N*Ho) and
    even|odd column groups side by side (Wo*C, 2*W2*C)."""
    h2, w2 = ho // 2, wo // 2
    rh = np.zeros((2 * n_img * h2, n_img * ho), np.float32)
    r = np.arange(h2)
    for n in range(n_img):
        rh[n * h2 + r, n * ho + 2 * r] = 1.0
        rh[n_img * h2 + n * h2 + r, n * ho + 2 * r + 1] = 1.0
    cw = np.zeros((wo * c, 2 * w2 * c), np.float32)
    eye = np.eye(c, dtype=np.float32)
    for w in range(w2):
        cw[2 * w * c:(2 * w + 1) * c, w * c:(w + 1) * c] = eye
        cw[(2 * w + 1) * c:(2 * w + 2) * c,
           w2 * c + w * c:w2 * c + (w + 1) * c] = eye
    return rh, cw


_LAYER_CFG = [
    # (weight, bias, k, stride, pad, out_pad, transposed, post, gamma, beta)
    ("enc_w1", "enc_b1", 5, 1, 2, 0, False, "bn_relu_pool", "bn1_g", "bn1_b"),
    ("enc_w2", "enc_b2", 3, 1, 1, 0, False, "bn_relu_pool", "bn2_g", "bn2_b"),
    ("enc_w3", "enc_b3", 3, 1, 1, 0, False, "sigmoid", None, None),
    ("dec_w1", "dec_b1", 3, 1, 1, 0, True, "bn_relu", "bn3_g", "bn3_b"),
    ("dec_w2", "dec_b2", 3, 2, 1, 1, True, "bn_relu", "bn4_g", "bn4_b"),
    ("dec_w3", "dec_b3", 5, 2, 2, 1, True, "sigmoid", None, None),
]


def prepare_autoencoder(params, n_img, h, w):
    """Build packed constant slabs + static per-layer plan (one-time)."""
    nar = _Slab(32, jnp.bfloat16, 16)       # narrow bf16 constants (<=32 lanes)
    wid = _Slab(256, jnp.bfloat16, 16)      # wide bf16 constants
    f32 = _Slab(256, jnp.float32, 8)        # biases / BN affine (precision)

    def add_bf16(arr):
        if arr.shape[1] <= 32:
            return "n", nar.add(arr)
        return "w", wid.add(arr)

    plan = []
    cur_h, cur_w, cur_c = h, w, 1
    for (wn, bn, k, stride, pad, opad, transposed, post, gn, btn) in _LAYER_CFG:
        wt = np.asarray(params[wn], np.float32)
        if transposed:
            # ConvTranspose2d == stride-1 conv over a zero-dilated input with
            # flipped / channel-transposed kernel and (k-1-p, k-1-p+op) pads.
            w_conv = wt[:, :, ::-1, ::-1].transpose(1, 0, 2, 3)
            pad0, pad1, s = k - 1 - pad, k - 1 - pad + opad, stride
        else:
            w_conv = wt
            pad0, pad1, s = pad, pad, 1
        o_sz = int(w_conv.shape[0])

        rp, ho = _rp_taps(n_img, cur_h, k, pad0, pad1, s)
        tb, wo = _toeplitz(w_conv, cur_w, pad0, pad1, s)
        bias = np.tile(np.asarray(params[bn], np.float32), wo)[None, :]

        rp_slab, rp_off = add_bf16(rp)
        tb_slab, tb_off = add_bf16(tb)
        L = dict(kh=k, ho=ho, wo=wo, o=o_sz, post=post,
                 nho=n_img * ho, nhin=n_img * cur_h,
                 wc=cur_w * cur_c, woo=wo * o_sz,
                 rp_slab=rp_slab, rp_off=rp_off,
                 tb_slab=tb_slab, tb_off=tb_off,
                 b_off=f32.add(bias))
        out_h, out_wc, out_w = ho, wo * o_sz, wo
        if post != "sigmoid":
            gb = np.stack([np.asarray(params[gn], np.float32),
                           np.asarray(params[btn], np.float32)], 0)
            L["gb_off"] = f32.add(gb)
        if post == "bn_relu_pool":
            rh, cw = _pool_mats(n_img, ho, wo, o_sz)
            rs, roff = add_bf16(rh)
            cs, coff = add_bf16(cw)
            L.update(rh_slab=rs, rh_off=roff, cw_slab=cs, cw_off=coff,
                     nh2=n_img * (ho // 2), w2o=(wo // 2) * o_sz)
            out_h, out_wc, out_w = ho // 2, (wo // 2) * o_sz, wo // 2
        L["out_h"], L["out_wc"] = out_h, out_wc
        plan.append(L)
        cur_h, cur_w, cur_c = out_h, out_w, o_sz

    consts = (nar.finalize(), wid.finalize(), f32.finalize())
    return consts, plan


# ---------------------------------------------------------------------------
# Fused forward kernel.
# ---------------------------------------------------------------------------

def _make_kernel(layers, n_img):
    def kernel(x_ref, nar_ref, wid_ref, f32_ref, out_ref):
        slabs = {"n": nar_ref, "w": wid_ref}

        def blk(slab, off, r, c):
            return slabs[slab][off:off + r, 0:c]

        act = x_ref[...].astype(jnp.bfloat16)            # (N*H, W*C)
        y = None
        for L in layers:
            kh, nho, wc = L["kh"], L["nho"], L["wc"]
            woo, o, wo = L["woo"], L["o"], L["wo"]

            # ---- conv / conv-transpose: ONE fused MXU matmul -------------
            rp = blk(L["rp_slab"], L["rp_off"], kh * nho, L["nhin"])
            placed = jnp.dot(rp, act, preferred_element_type=jnp.float32)
            xcat = jnp.concatenate(
                [placed[i * nho:(i + 1) * nho, :] for i in range(kh)],
                axis=1).astype(jnp.bfloat16)             # (N*Ho, kh*W*C)
            tb = blk(L["tb_slab"], L["tb_off"], kh * wc, woo)
            bias = f32_ref[L["b_off"]:L["b_off"] + 1, 0:woo]
            y = jnp.dot(xcat, tb, preferred_element_type=jnp.float32) + bias

            if L["post"] == "sigmoid":
                y = jax.nn.sigmoid(y)
            else:
                # ---- BatchNorm (batch stats, one pass) + ReLU ------------
                gb = f32_ref[L["gb_off"]:L["gb_off"] + 2, 0:o]   # [gamma;beta]
                stats = jnp.concatenate(
                    [jnp.sum(y, axis=0, keepdims=True),
                     jnp.sum(y * y, axis=0, keepdims=True)], axis=0)  # (2,Wo*O)
                acc = stats[:, 0:o]                      # exact f32 collapse
                for wi in range(1, wo):
                    acc = acc + stats[:, wi * o:(wi + 1) * o]
                inv_cnt = 1.0 / float(n_img * L["ho"] * wo)
                mean = acc[0:1, :] * inv_cnt
                ex2 = acc[1:2, :] * inv_cnt
                inv_std = jax.lax.rsqrt(ex2 - mean * mean + _EPS)
                scale = gb[0:1, :] * inv_std
                shift = gb[1:2, :] - mean * scale
                ss = jnp.concatenate(
                    [jnp.concatenate([scale, shift], axis=0)] * wo,
                    axis=1)                              # (2, Wo*O) f32 tile
                y = jnp.maximum(y * ss[0:1, :] + ss[1:2, :], 0.0)

                if L["post"] == "bn_relu_pool":          # fused MaxPool2d(2,2)
                    nh2, w2o = L["nh2"], L["w2o"]
                    rh = blk(L["rh_slab"], L["rh_off"], 2 * nh2, nho)
                    cw = blk(L["cw_slab"], L["cw_off"], woo, 2 * w2o)
                    r2 = jnp.dot(rh, y.astype(jnp.bfloat16),
                                 preferred_element_type=jnp.float32)
                    rmax = jnp.maximum(r2[0:nh2, :], r2[nh2:2 * nh2, :])
                    c2 = jnp.dot(rmax.astype(jnp.bfloat16), cw,
                                 preferred_element_type=jnp.float32)
                    y = jnp.maximum(c2[:, 0:w2o], c2[:, w2o:2 * w2o])

            act = y.astype(jnp.bfloat16)
        out_ref[...] = y
    return kernel


def _build_forward(plan, n_img, h, w, stop):
    layers = plan[:3] if stop else plan
    out_h, out_wc = layers[-1]["out_h"], layers[-1]["out_wc"]
    call = pl.pallas_call(
        _make_kernel(layers, n_img),
        out_shape=jax.ShapeDtypeStruct((n_img * out_h, out_wc), jnp.float32),
        in_specs=[_VMEM] * 4,
        out_specs=_VMEM,
    )

    @jax.jit
    def fwd(narrow, wide, f32s, x):
        xf = x.reshape(n_img * h, w).astype(jnp.float32)
        out = call(xf, narrow, wide, f32s)
        if stop:
            return out.reshape(n_img, out_h * out_wc)    # x.view(x.size(0), -1)
        return out.reshape(n_img, 1, out_h, out_wc)

    return fwd


class PallasAutoencoder:
    """Fused Pallas TPU forward for the PyTorch `Autoencoder` (training-mode BN)."""

    def __init__(self, params, n_img, h, w):
        self.consts, self.plan = prepare_autoencoder(params, n_img, h, w)
        self._full = _build_forward(self.plan, n_img, h, w, stop=False)
        self._enc = _build_forward(self.plan, n_img, h, w, stop=True)

    def __call__(self, x, stop=False):
        fwd = self._enc if stop else self._full
        return fwd(*self.consts, x)


# ---------------------------------------------------------------------------
# Parameters (PyTorch default-init style).
# ---------------------------------------------------------------------------

def init_params(key):
    ks = jax.random.split(key, 20)

    def u(k, shape, fan_in):
        bound = 1.0 / np.sqrt(fan_in)
        return jax.random.uniform(k, shape, jnp.float32, -bound, bound)

    p = {}
    p["enc_w1"] = u(ks[0], (16, 1, 5, 5), 1 * 25)
    p["enc_b1"] = u(ks[1], (16,), 1 * 25)
    p["bn1_g"] = 1.0 + 0.1 * u(ks[2], (16,), 1.0)
    p["bn1_b"] = 0.1 * u(ks[3], (16,), 1.0)
    p["enc_w2"] = u(ks[4], (32, 16, 3, 3), 16 * 9)
    p["enc_b2"] = u(ks[5], (32,), 16 * 9)
    p["bn2_g"] = 1.0 + 0.1 * u(ks[6], (32,), 1.0)
    p["bn2_b"] = 0.1 * u(ks[7], (32,), 1.0)
    p["enc_w3"] = u(ks[8], (1, 32, 3, 3), 32 * 9)
    p["enc_b3"] = u(ks[9], (1,), 32 * 9)
    # ConvTranspose2d weights stay in PyTorch (in_ch, out_ch, kh, kw) layout.
    p["dec_w1"] = u(ks[10], (1, 32, 3, 3), 32 * 9)
    p["dec_b1"] = u(ks[11], (32,), 32 * 9)
    p["bn3_g"] = 1.0 + 0.1 * u(ks[12], (32,), 1.0)
    p["bn3_b"] = 0.1 * u(ks[13], (32,), 1.0)
    p["dec_w2"] = u(ks[14], (32, 16, 3, 3), 16 * 9)
    p["dec_b2"] = u(ks[15], (16,), 16 * 9)
    p["bn4_g"] = 1.0 + 0.1 * u(ks[16], (16,), 1.0)
    p["bn4_b"] = 0.1 * u(ks[17], (16,), 1.0)
    p["dec_w3"] = u(ks[18], (16, 1, 5, 5), 1 * 25)
    p["dec_b3"] = u(ks[19], (1,), 1 * 25)
    return p


# ---------------------------------------------------------------------------
# Pure-JAX reference (PyTorch training-mode semantics).
# ---------------------------------------------------------------------------

def reference_forward(params, x, stop=False):
    dn = ("NCHW", "OIHW", "NCHW")

    def conv(x, w, b, pad):
        y = jax.lax.conv_general_dilated(
            x, w, (1, 1), [(pad, pad)] * 2, dimension_numbers=dn)
        return y + b[None, :, None, None]

    def conv_t(x, w_t, b, k, s, p, op):
        w = jnp.flip(w_t, axis=(2, 3)).transpose(1, 0, 2, 3)
        y = jax.lax.conv_general_dilated(
            x, w, (1, 1), [(k - 1 - p, k - 1 - p + op)] * 2,
            lhs_dilation=(s, s), dimension_numbers=dn)
        return y + b[None, :, None, None]

    def bn_relu(x, g, be):
        m = x.mean(axis=(0, 2, 3), keepdims=True)
        v = ((x - m) ** 2).mean(axis=(0, 2, 3), keepdims=True)
        y = (x - m) * jax.lax.rsqrt(v + _EPS)
        y = y * g[None, :, None, None] + be[None, :, None, None]
        return jnp.maximum(y, 0.0)

    def pool(x):
        n, c, hh, ww = x.shape
        return x.reshape(n, c, hh // 2, 2, ww // 2, 2).max(axis=(3, 5))

    h = pool(bn_relu(conv(x, params["enc_w1"], params["enc_b1"], 2),
                     params["bn1_g"], params["bn1_b"]))
    h = pool(bn_relu(conv(h, params["enc_w2"], params["enc_b2"], 1),
                     params["bn2_g"], params["bn2_b"]))
    enc = jax.nn.sigmoid(conv(h, params["enc_w3"], params["enc_b3"], 1))
    if stop:
        return enc.reshape(enc.shape[0], -1)
    h = bn_relu(conv_t(enc, params["dec_w1"], params["dec_b1"], 3, 1, 1, 0),
                params["bn3_g"], params["bn3_b"])
    h = bn_relu(conv_t(h, params["dec_w2"], params["dec_b2"], 3, 2, 1, 1),
                params["bn4_g"], params["bn4_b"])
    return jax.nn.sigmoid(conv_t(h, params["dec_w3"], params["dec_b3"], 5, 2, 2, 1))


# ---------------------------------------------------------------------------
# main
# ---------------------------------------------------------------------------

if __name__ == "__main__":
    key = jax.random.PRNGKey(0)
    kp, kx = jax.random.split(key)
    params = init_params(kp)
    x = jax.random.normal(kx, (2, 1, 16, 16), jnp.float32)   # small NCHW input

    model = PallasAutoencoder(params, n_img=2, h=16, w=16)    # one-time prepare

    out = jax.block_until_ready(model(x, stop=False))
    lat = jax.block_until_ready(model(x, stop=True))

    assert out.shape == (2, 1, 16, 16), out.shape
    assert lat.shape == (2, 16), lat.shape

    ref_out = np.asarray(reference_forward(params, x, stop=False))
    ref_lat = np.asarray(reference_forward(params, x, stop=True))
    # bf16 MXU operands over 6 fused layers -> slightly loose tolerance vs the
    # pure-f32 reference (BN statistics / affine are kept in f32 in-kernel).
    np.testing.assert_allclose(np.asarray(out), ref_out, rtol=4e-2, atol=4e-2)
    np.testing.assert_allclose(np.asarray(lat), ref_lat, rtol=4e-2, atol=4e-2)

    print("KERNEL_OK")
</pallas_src>

<mosaic_0001>
module attributes {stable_mosaic.version = 11 : i64} {
  func.func @kernel(%arg0: memref<32x16xf32, #tpu.memory_space<vmem>>, %arg1: memref<1552x32xbf16, #tpu.memory_space<vmem>>, %arg2: memref<1376x256xbf16, #tpu.memory_space<vmem>>, %arg3: memref<80x256xf32, #tpu.memory_space<vmem>>, %arg4: memref<32x16xf32, #tpu.memory_space<vmem>>) attributes {dimension_semantics = [], scalar_prefetch = 0 : i64, scratch_operands = 0 : i64, tpu.core_type = #tpu.core_type<tc>} {
    %c0 = arith.constant 0 : index
    %c0_0 = arith.constant 0 : index
    %0 = vector.load %arg0[%c0, %c0_0] : memref<32x16xf32, #tpu.memory_space<vmem>>, vector<32x16xf32>
    %1 = arith.truncf %0 : vector<32x16xf32> to vector<32x16xbf16>
    %c0_1 = arith.constant 0 : index
    %c0_2 = arith.constant 0 : index
    %2 = vector.load %arg1[%c0_1, %c0_2] : memref<1552x32xbf16, #tpu.memory_space<vmem>>, vector<160x32xbf16>
    %cst = arith.constant dense<0.000000e+00> : vector<160x16xf32>
    %3 = tpu.matmul %2, %1, %cst {dimension_numbers = #tpu.dot_dimension_numbers<[1], [0], [0], [1], [0, 0, 1, 1], [], []>} : vector<160x32xbf16>, vector<32x16xbf16>, vector<160x16xf32> -> vector<160x16xf32>
    %4 = vector.extract_strided_slice %3 {offsets = [0, 0], sizes = [32, 16], strides = [1, 1]} : vector<160x16xf32> to vector<32x16xf32>
    %5 = vector.extract_strided_slice %3 {offsets = [32, 0], sizes = [32, 16], strides = [1, 1]} : vector<160x16xf32> to vector<32x16xf32>
    %6 = vector.extract_strided_slice %3 {offsets = [64, 0], sizes = [32, 16], strides = [1, 1]} : vector<160x16xf32> to vector<32x16xf32>
    %7 = vector.extract_strided_slice %3 {offsets = [96, 0], sizes = [32, 16], strides = [1, 1]} : vector<160x16xf32> to vector<32x16xf32>
    %8 = vector.extract_strided_slice %3 {offsets = [128, 0], sizes = [32, 16], strides = [1, 1]} : vector<160x16xf32> to vector<32x16xf32>
    %9 = tpu.concatenate %4, %5, %6, %7, %8 in 1 : vector<32x16xf32>, vector<32x16xf32>, vector<32x16xf32>, vector<32x16xf32>, vector<32x16xf32> -> vector<32x80xf32>
    %10 = arith.truncf %9 : vector<32x80xf32> to vector<32x80xbf16>
    %c0_3 = arith.constant 0 : index
    %c0_4 = arith.constant 0 : index
    %11 = vector.load %arg2[%c0_3, %c0_4] : memref<1376x256xbf16, #tpu.memory_space<vmem>>, vector<80x256xbf16>
    %c0_5 = arith.constant 0 : index
    %c0_6 = arith.constant 0 : index
    %12 = vector.load %arg3[%c0_5, %c0_6] : memref<80x256xf32, #tpu.memory_space<vmem>>, vector<1x256xf32>
    %cst_7 = arith.constant dense<0.000000e+00> : vector<32x256xf32>
    %13 = tpu.matmul %10, %11, %cst_7 {dimension_numbers = #tpu.dot_dimension_numbers<[1], [0], [0], [1], [0, 0, 1, 1], [], []>} : vector<32x80xbf16>, vector<80x256xbf16>, vector<32x256xf32> -> vector<32x256xf32>
    %14 = vector.broadcast %12 : vector<1x256xf32> to vector<32x256xf32>
    %15 = arith.addf %13, %14 : vector<32x256xf32>
    %c8 = arith.constant 8 : index
    %c0_8 = arith.constant 0 : index
    %16 = vector.load %arg3[%c8, %c0_8] : memref<80x256xf32, #tpu.memory_space<vmem>>, vector<2x16xf32>
    %cst_9 = arith.constant dense<0.000000e+00> : vector<256xf32>
    %17 = vector.multi_reduction <add>, %15, %cst_9 [0] : vector<32x256xf32> to vector<256xf32>
    %18 = vector.shape_cast %17 : vector<256xf32> to vector<1x256xf32>
    %19 = arith.mulf %15, %15 : vector<32x256xf32>
    %cst_10 = arith.constant dense<0.000000e+00> : vector<256xf32>
    %20 = vector.multi_reduction <add>, %19, %cst_10 [0] : vector<32x256xf32> to vector<256xf32>
    %21 = vector.shape_cast %20 : vector<256xf32> to vector<1x256xf32>
    %22 = tpu.concatenate %18, %21 in 0 : vector<1x256xf32>, vector<1x256xf32> -> vector<2x256xf32>
    %23 = vector.extract_strided_slice %22 {offsets = [0, 0], sizes = [2, 16], strides = [1, 1]} : vector<2x256xf32> to vector<2x16xf32>
    %24 = vector.extract_strided_slice %22 {offsets = [0, 16], sizes = [2, 16], strides = [1, 1]} : vector<2x256xf32> to vector<2x16xf32>
    %25 = arith.addf %23, %24 : vector<2x16xf32>
    %26 = vector.extract_strided_slice %22 {offsets = [0, 32], sizes = [2, 16], strides = [1, 1]} : vector<2x256xf32> to vector<2x16xf32>
    %27 = arith.addf %25, %26 : vector<2x16xf32>
    %28 = vector.extract_strided_slice %22 {offsets = [0, 48], sizes = [2, 16], strides = [1, 1]} : vector<2x256xf32> to vector<2x16xf32>
    %29 = arith.addf %27, %28 : vector<2x16xf32>
    %30 = vector.extract_strided_slice %22 {offsets = [0, 64], sizes = [2, 16], strides = [1, 1]} : vector<2x256xf32> to vector<2x16xf32>
    %31 = arith.addf %29, %30 : vector<2x16xf32>
    %32 = vector.extract_strided_slice %22 {offsets = [0, 80], sizes = [2, 16], strides = [1, 1]} : vector<2x256xf32> to vector<2x16xf32>
    %33 = arith.addf %31, %32 : vector<2x16xf32>
    %34 = vector.extract_strided_slice %22 {offsets = [0, 96], sizes = [2, 16], strides = [1, 1]} : vector<2x256xf32> to vector<2x16xf32>
    %35 = arith.addf %33, %34 : vector<2x16xf32>
    %36 = vector.extract_strided_slice %22 {offsets = [0, 112], sizes = [2, 16], strides = [1, 1]} : vector<2x256xf32> to vector<2x16xf32>
    %37 = arith.addf %35, %36 : vector<2x16xf32>
    %38 = vector.extract_strided_slice %22 {offsets = [0, 128], sizes = [2, 16], strides = [1, 1]} : vector<2x256xf32> to vector<2x16xf32>
    %39 = arith.addf %37, %38 : vector<2x16xf32>
    %40 = vector.extract_strided_slice %22 {offsets = [0, 144], sizes = [2, 16], strides = [1, 1]} : vector<2x256xf32> to vector<2x16xf32>
    %41 = arith.addf %39, %40 : vector<2x16xf32>
    %42 = vector.extract_strided_slice %22 {offsets = [0, 160], sizes = [2, 16], strides = [1, 1]} : vector<2x256xf32> to vector<2x16xf32>
    %43 = arith.addf %41, %42 : vector<2x16xf32>
    %44 = vector.extract_strided_slice %22 {offsets = [0, 176], sizes = [2, 16], strides = [1, 1]} : vector<2x256xf32> to vector<2x16xf32>
    %45 = arith.addf %43, %44 : vector<2x16xf32>
    %46 = vector.extract_strided_slice %22 {offsets = [0, 192], sizes = [2, 16], strides = [1, 1]} : vector<2x256xf32> to vector<2x16xf32>
    %47 = arith.addf %45, %46 : vector<2x16xf32>
    %48 = vector.extract_strided_slice %22 {offsets = [0, 208], sizes = [2, 16], strides = [1, 1]} : vector<2x256xf32> to vector<2x16xf32>
    %49 = arith.addf %47, %48 : vector<2x16xf32>
    %50 = vector.extract_strided_slice %22 {offsets = [0, 224], sizes = [2, 16], strides = [1, 1]} : vector<2x256xf32> to vector<2x16xf32>
    %51 = arith.addf %49, %50 : vector<2x16xf32>
    %52 = vector.extract_strided_slice %22 {offsets = [0, 240], sizes = [2, 16], strides = [1, 1]} : vector<2x256xf32> to vector<2x16xf32>
    %53 = arith.addf %51, %52 : vector<2x16xf32>
    %54 = vector.extract_strided_slice %53 {offsets = [0, 0], sizes = [1, 16], strides = [1, 1]} : vector<2x16xf32> to vector<1x16xf32>
    %cst_11 = arith.constant 0.001953125 : f32
    %55 = vector.broadcast %cst_11 : f32 to vector<1x16xf32>
    %56 = arith.mulf %54, %55 : vector<1x16xf32>
    %57 = vector.extract_strided_slice %53 {offsets = [1, 0], sizes = [1, 16], strides = [1, 1]} : vector<2x16xf32> to vector<1x16xf32>
    %cst_12 = arith.constant 0.001953125 : f32
    %58 = vector.broadcast %cst_12 : f32 to vector<1x16xf32>
    %59 = arith.mulf %57, %58 : vector<1x16xf32>
    %60 = arith.mulf %56, %56 : vector<1x16xf32>
    %61 = arith.subf %59, %60 : vector<1x16xf32>
    %cst_13 = arith.constant 9.99999974E-6 : f32
    %62 = vector.broadcast %cst_13 : f32 to vector<1x16xf32>
    %63 = arith.addf %61, %62 : vector<1x16xf32>
    %64 = math.rsqrt %63 : vector<1x16xf32>
    %65 = vector.extract_strided_slice %16 {offsets = [0, 0], sizes = [1, 16], strides = [1, 1]} : vector<2x16xf32> to vector<1x16xf32>
    %66 = arith.mulf %65, %64 : vector<1x16xf32>
    %67 = vector.extract_strided_slice %16 {offsets = [1, 0], sizes = [1, 16], strides = [1, 1]} : vector<2x16xf32> to vector<1x16xf32>
    %68 = arith.mulf %56, %66 : vector<1x16xf32>
    %69 = arith.subf %67, %68 : vector<1x16xf32>
    %70 = tpu.concatenate %66, %69 in 0 : vector<1x16xf32>, vector<1x16xf32> -> vector<2x16xf32>
    %71 = tpu.concatenate %70, %70, %70, %70, %70, %70, %70, %70, %70, %70, %70, %70, %70, %70, %70, %70 in 1 : vector<2x16xf32>, vector<2x16xf32>, vector<2x16xf32>, vector<2x16xf32>, vector<2x16xf32>, vector<2x16xf32>, vector<2x16xf32>, vector<2x16xf32>, vector<2x16xf32>, vector<2x16xf32>, vector<2x16xf32>, vector<2x16xf32>, vector<2x16xf32>, vector<2x16xf32>, vector<2x16xf32>, vector<2x16xf32> -> vector<2x256xf32>
    %72 = vector.extract_strided_slice %71 {offsets = [0, 0], sizes = [1, 256], strides = [1, 1]} : vector<2x256xf32> to vector<1x256xf32>
    %73 = vector.broadcast %72 : vector<1x256xf32> to vector<32x256xf32>
    %74 = arith.mulf %15, %73 : vector<32x256xf32>
    %75 = vector.extract_strided_slice %71 {offsets = [1, 0], sizes = [1, 256], strides = [1, 1]} : vector<2x256xf32> to vector<1x256xf32>
    %76 = vector.broadcast %75 : vector<1x256xf32> to vector<32x256xf32>
    %77 = arith.addf %74, %76 : vector<32x256xf32>
    %cst_14 = arith.constant 0.000000e+00 : f32
    %78 = vector.broadcast %cst_14 : f32 to vector<32x256xf32>
    %79 = arith.maximumf %77, %78 : vector<32x256xf32>
    %c160 = arith.constant 160 : index
    %c0_15 = arith.constant 0 : index
    %80 = vector.load %arg1[%c160, %c0_15] : memref<1552x32xbf16, #tpu.memory_space<vmem>>, vector<32x32xbf16>
    %c80 = arith.constant 80 : index
    %c0_16 = arith.constant 0 : index
    %81 = vector.load %arg2[%c80, %c0_16] : memref<1376x256xbf16, #tpu.memory_space<vmem>>, vector<256x256xbf16>
    %82 = arith.truncf %79 : vector<32x256xf32> to vector<32x256xbf16>
    %cst_17 = arith.constant dense<0.000000e+00> : vector<32x256xf32>
    %83 = tpu.matmul %80, %82, %cst_17 {dimension_numbers = #tpu.dot_dimension_numbers<[1], [0], [0], [1], [0, 0, 1, 1], [], []>} : vector<32x32xbf16>, vector<32x256xbf16>, vector<32x256xf32> -> vector<32x256xf32>
    %84 = vector.extract_strided_slice %83 {offsets = [0, 0], sizes = [16, 256], strides = [1, 1]} : vector<32x256xf32> to vector<16x256xf32>
    %85 = vector.extract_strided_slice %83 {offsets = [16, 0], sizes = [16, 256], strides = [1, 1]} : vector<32x256xf32> to vector<16x256xf32>
    %86 = arith.maximumf %84, %85 : vector<16x256xf32>
    %87 = arith.truncf %86 : vector<16x256xf32> to vector<16x256xbf16>
    %cst_18 = arith.constant dense<0.000000e+00> : vector<16x256xf32>
    %88 = tpu.matmul %87, %81, %cst_18 {dimension_numbers = #tpu.dot_dimension_numbers<[1], [0], [0], [1], [0, 0, 1, 1], [], []>} : vector<16x256xbf16>, vector<256x256xbf16>, vector<16x256xf32> -> vector<16x256xf32>
    %89 = vector.extract_strided_slice %88 {offsets = [0, 0], sizes = [16, 128], strides = [1, 1]} : vector<16x256xf32> to vector<16x128xf32>
    %90 = vector.extract_strided_slice %88 {offsets = [0, 128], sizes = [16, 128], strides = [1, 1]} : vector<16x256xf32> to vector<16x128xf32>
    %91 = arith.maximumf %89, %90 : vector<16x128xf32>
    %92 = arith.truncf %91 : vector<16x128xf32> to vector<16x128xbf16>
    %c192 = arith.constant 192 : index
    %c0_19 = arith.constant 0 : index
    %93 = vector.load %arg1[%c192, %c0_19] : memref<1552x32xbf16, #tpu.memory_space<vmem>>, vector<48x16xbf16>
    %cst_20 = arith.constant dense<0.000000e+00> : vector<48x128xf32>
    %94 = tpu.matmul %93, %92, %cst_20 {dimension_numbers = #tpu.dot_dimension_numbers<[1], [0], [0], [1], [0, 0, 1, 1], [], []>} : vector<48x16xbf16>, vector<16x128xbf16>, vector<48x128xf32> -> vector<48x128xf32>
    %95 = vector.extract_strided_slice %94 {offsets = [0, 0], sizes = [16, 128], strides = [1, 1]} : vector<48x128xf32> to vector<16x128xf32>
    %96 = vector.extract_strided_slice %94 {offsets = [16, 0], sizes = [16, 128], strides = [1, 1]} : vector<48x128xf32> to vector<16x128xf32>
    %97 = vector.extract_strided_slice %94 {offsets = [32, 0], sizes = [16, 128], strides = [1, 1]} : vector<48x128xf32> to vector<16x128xf32>
    %98 = tpu.concatenate %95, %96, %97 in 1 : vector<16x128xf32>, vector<16x128xf32>, vector<16x128xf32> -> vector<16x384xf32>
    %99 = arith.truncf %98 : vector<16x384xf32> to vector<16x384xbf16>
    %c336 = arith.constant 336 : index
    %c0_21 = arith.constant 0 : index
    %100 = vector.load %arg2[%c336, %c0_21] : memref<1376x256xbf16, #tpu.memory_space<vmem>>, vector<384x256xbf16>
    %c16 = arith.constant 16 : index
    %c0_22 = arith.constant 0 : index
    %101 = vector.load %arg3[%c16, %c0_22] : memref<80x256xf32, #tpu.memory_space<vmem>>, vector<1x256xf32>
    %cst_23 = arith.constant dense<0.000000e+00> : vector<16x256xf32>
    %102 = tpu.matmul %99, %100, %cst_23 {dimension_numbers = #tpu.dot_dimension_numbers<[1], [0], [0], [1], [0, 0, 1, 1], [], []>} : vector<16x384xbf16>, vector<384x256xbf16>, vector<16x256xf32> -> vector<16x256xf32>
    %103 = vector.broadcast %101 : vector<1x256xf32> to vector<16x256xf32>
    %104 = arith.addf %102, %103 : vector<16x256xf32>
    %c24 = arith.constant 24 : index
    %c0_24 = arith.constant 0 : index
    %105 = vector.load %arg3[%c24, %c0_24] : memref<80x256xf32, #tpu.memory_space<vmem>>, vector<2x32xf32>
    %cst_25 = arith.constant dense<0.000000e+00> : vector<256xf32>
    %106 = vector.multi_reduction <add>, %104, %cst_25 [0] : vector<16x256xf32> to vector<256xf32>
    %107 = vector.shape_cast %106 : vector<256xf32> to vector<1x256xf32>
    %108 = arith.mulf %104, %104 : vector<16x256xf32>
    %cst_26 = arith.constant dense<0.000000e+00> : vector<256xf32>
    %109 = vector.multi_reduction <add>, %108, %cst_26 [0] : vector<16x256xf32> to vector<256xf32>
    %110 = vector.shape_cast %109 : vector<256xf32> to vector<1x256xf32>
    %111 = tpu.concatenate %107, %110 in 0 : vector<1x256xf32>, vector<1x256xf32> -> vector<2x256xf32>
    %112 = vector.extract_strided_slice %111 {offsets = [0, 0], sizes = [2, 32], strides = [1, 1]} : vector<2x256xf32> to vector<2x32xf32>
    %113 = vector.extract_strided_slice %111 {offsets = [0, 32], sizes = [2, 32], strides = [1, 1]} : vector<2x256xf32> to vector<2x32xf32>
    %114 = arith.addf %112, %113 : vector<2x32xf32>
    %115 = vector.extract_strided_slice %111 {offsets = [0, 64], sizes = [2, 32], strides = [1, 1]} : vector<2x256xf32> to vector<2x32xf32>
    %116 = arith.addf %114, %115 : vector<2x32xf32>
    %117 = vector.extract_strided_slice %111 {offsets = [0, 96], sizes = [2, 32], strides = [1, 1]} : vector<2x256xf32> to vector<2x32xf32>
    %118 = arith.addf %116, %117 : vector<2x32xf32>
    %119 = vector.extract_strided_slice %111 {offsets = [0, 128], sizes = [2, 32], strides = [1, 1]} : vector<2x256xf32> to vector<2x32xf32>
    %120 = arith.addf %118, %119 : vector<2x32xf32>
    %121 = vector.extract_strided_slice %111 {offsets = [0, 160], sizes = [2, 32], strides = [1, 1]} : vector<2x256xf32> to vector<2x32xf32>
    %122 = arith.addf %120, %121 : vector<2x32xf32>
    %123 = vector.extract_strided_slice %111 {offsets = [0, 192], sizes = [2, 32], strides = [1, 1]} : vector<2x256xf32> to vector<2x32xf32>
    %124 = arith.addf %122, %123 : vector<2x32xf32>
    %125 = vector.extract_strided_slice %111 {offsets = [0, 224], sizes = [2, 32], strides = [1, 1]} : vector<2x256xf32> to vector<2x32xf32>
    %126 = arith.addf %124, %125 : vector<2x32xf32>
    %127 = vector.extract_strided_slice %126 {offsets = [0, 0], sizes = [1, 32], strides = [1, 1]} : vector<2x32xf32> to vector<1x32xf32>
    %cst_27 = arith.constant 7.812500e-03 : f32
    %128 = vector.broadcast %cst_27 : f32 to vector<1x32xf32>
    %129 = arith.mulf %127, %128 : vector<1x32xf32>
    %130 = vector.extract_strided_slice %126 {offsets = [1, 0], sizes = [1, 32], strides = [1, 1]} : vector<2x32xf32> to vector<1x32xf32>
    %cst_28 = arith.constant 7.812500e-03 : f32
    %131 = vector.broadcast %cst_28 : f32 to vector<1x32xf32>
    %132 = arith.mulf %130, %131 : vector<1x32xf32>
    %133 = arith.mulf %129, %129 : vector<1x32xf32>
    %134 = arith.subf %132, %133 : vector<1x32xf32>
    %cst_29 = arith.constant 9.99999974E-6 : f32
    %135 = vector.broadcast %cst_29 : f32 to vector<1x32xf32>
    %136 = arith.addf %134, %135 : vector<1x32xf32>
    %137 = math.rsqrt %136 : vector<1x32xf32>
    %138 = vector.extract_strided_slice %105 {offsets = [0, 0], sizes = [1, 32], strides = [1, 1]} : vector<2x32xf32> to vector<1x32xf32>
    %139 = arith.mulf %138, %137 : vector<1x32xf32>
    %140 = vector.extract_strided_slice %105 {offsets = [1, 0], sizes = [1, 32], strides = [1, 1]} : vector<2x32xf32> to vector<1x32xf32>
    %141 = arith.mulf %129, %139 : vector<1x32xf32>
    %142 = arith.subf %140, %141 : vector<1x32xf32>
    %143 = tpu.concatenate %139, %142 in 0 : vector<1x32xf32>, vector<1x32xf32> -> vector<2x32xf32>
    %144 = tpu.concatenate %143, %143, %143, %143, %143, %143, %143, %143 in 1 : vector<2x32xf32>, vector<2x32xf32>, vector<2x32xf32>, vector<2x32xf32>, vector<2x32xf32>, vector<2x32xf32>, vector<2x32xf32>, vector<2x32xf32> -> vector<2x256xf32>
    %145 = vector.extract_strided_slice %144 {offsets = [0, 0], sizes = [1, 256], strides = [1, 1]} : vector<2x256xf32> to vector<1x256xf32>
    %146 = vector.broadcast %145 : vector<1x256xf32> to vector<16x256xf32>
    %147 = arith.mulf %104, %146 : vector<16x256xf32>
    %148 = vector.extract_strided_slice %144 {offsets = [1, 0], sizes = [1, 256], strides = [1, 1]} : vector<2x256xf32> to vector<1x256xf32>
    %149 = vector.broadcast %148 : vector<1x256xf32> to vector<16x256xf32>
    %150 = arith.addf %147, %149 : vector<16x256xf32>
    %cst_30 = arith.constant 0.000000e+00 : f32
    %151 = vector.broadcast %cst_30 : f32 to vector<16x256xf32>
    %152 = arith.maximumf %150, %151 : vector<16x256xf32>
    %c240 = arith.constant 240 : index
    %c0_31 = arith.constant 0 : index
    %153 = vector.load %arg1[%c240, %c0_31] : memref<1552x32xbf16, #tpu.memory_space<vmem>>, vector<16x16xbf16>
    %c720 = arith.constant 720 : index
    %c0_32 = arith.constant 0 : index
    %154 = vector.load %arg2[%c720, %c0_32] : memref<1376x256xbf16, #tpu.memory_space<vmem>>, vector<256x256xbf16>
    %155 = arith.truncf %152 : vector<16x256xf32> to vector<16x256xbf16>
    %cst_33 = arith.constant dense<0.000000e+00> : vector<16x256xf32>
    %156 = tpu.matmul %153, %155, %cst_33 {dimension_numbers = #tpu.dot_dimension_numbers<[1], [0], [0], [1], [0, 0, 1, 1], [], []>} : vector<16x16xbf16>, vector<16x256xbf16>, vector<16x256xf32> -> vector<16x256xf32>
    %157 = vector.extract_strided_slice %156 {offsets = [0, 0], sizes = [8, 256], strides = [1, 1]} : vector<16x256xf32> to vector<8x256xf32>
    %158 = vector.extract_strided_slice %156 {offsets = [8, 0], sizes = [8, 256], strides = [1, 1]} : vector<16x256xf32> to vector<8x256xf32>
    %159 = arith.maximumf %157, %158 : vector<8x256xf32>
    %160 = arith.truncf %159 : vector<8x256xf32> to vector<8x256xbf16>
    %cst_34 = arith.constant dense<0.000000e+00> : vector<8x256xf32>
    %161 = tpu.matmul %160, %154, %cst_34 {dimension_numbers = #tpu.dot_dimension_numbers<[1], [0], [0], [1], [0, 0, 1, 1], [], []>} : vector<8x256xbf16>, vector<256x256xbf16>, vector<8x256xf32> -> vector<8x256xf32>
    %162 = vector.extract_strided_slice %161 {offsets = [0, 0], sizes = [8, 128], strides = [1, 1]} : vector<8x256xf32> to vector<8x128xf32>
    %163 = vector.extract_strided_slice %161 {offsets = [0, 128], sizes = [8, 128], strides = [1, 1]} : vector<8x256xf32> to vector<8x128xf32>
    %164 = arith.maximumf %162, %163 : vector<8x128xf32>
    %165 = arith.truncf %164 : vector<8x128xf32> to vector<8x128xbf16>
    %c256 = arith.constant 256 : index
    %c0_35 = arith.constant 0 : index
    %166 = vector.load %arg1[%c256, %c0_35] : memref<1552x32xbf16, #tpu.memory_space<vmem>>, vector<24x8xbf16>
    %cst_36 = arith.constant dense<0.000000e+00> : vector<24x128xf32>
    %167 = tpu.matmul %166, %165, %cst_36 {dimension_numbers = #tpu.dot_dimension_numbers<[1], [0], [0], [1], [0, 0, 1, 1], [], []>} : vector<24x8xbf16>, vector<8x128xbf16>, vector<24x128xf32> -> vector<24x128xf32>
    %168 = vector.extract_strided_slice %167 {offsets = [0, 0], sizes = [8, 128], strides = [1, 1]} : vector<24x128xf32> to vector<8x128xf32>
    %169 = vector.extract_strided_slice %167 {offsets = [8, 0], sizes = [8, 128], strides = [1, 1]} : vector<24x128xf32> to vector<8x128xf32>
    %170 = vector.extract_strided_slice %167 {offsets = [16, 0], sizes = [8, 128], strides = [1, 1]} : vector<24x128xf32> to vector<8x128xf32>
    %171 = tpu.concatenate %168, %169, %170 in 1 : vector<8x128xf32>, vector<8x128xf32>, vector<8x128xf32> -> vector<8x384xf32>
    %172 = arith.truncf %171 : vector<8x384xf32> to vector<8x384xbf16>
    %c288 = arith.constant 288 : index
    %c0_37 = arith.constant 0 : index
    %173 = vector.load %arg1[%c288, %c0_37] : memref<1552x32xbf16, #tpu.memory_space<vmem>>, vector<384x4xbf16>
    %c32 = arith.constant 32 : index
    %c0_38 = arith.constant 0 : index
    %174 = vector.load %arg3[%c32, %c0_38] : memref<80x256xf32, #tpu.memory_space<vmem>>, vector<1x4xf32>
    %cst_39 = arith.constant dense<0.000000e+00> : vector<8x4xf32>
    %175 = tpu.matmul %172, %173, %cst_39 {dimension_numbers = #tpu.dot_dimension_numbers<[1], [0], [0], [1], [0, 0, 1, 1], [], []>} : vector<8x384xbf16>, vector<384x4xbf16>, vector<8x4xf32> -> vector<8x4xf32>
    %176 = vector.broadcast %174 : vector<1x4xf32> to vector<8x4xf32>
    %177 = arith.addf %175, %176 : vector<8x4xf32>
    %178 = arith.negf %177 : vector<8x4xf32>
    %179 = math.exp %178 : vector<8x4xf32>
    %cst_40 = arith.constant 1.000000e+00 : f32
    %180 = vector.broadcast %cst_40 : f32 to vector<8x4xf32>
    %181 = arith.addf %180, %179 : vector<8x4xf32>
    %182 = arith.divf %180, %181 : vector<8x4xf32>
    %183 = arith.truncf %182 : vector<8x4xf32> to vector<8x4xbf16>
    %c672 = arith.constant 672 : index
    %c0_41 = arith.constant 0 : index
    %184 = vector.load %arg1[%c672, %c0_41] : memref<1552x32xbf16, #tpu.memory_space<vmem>>, vector<24x8xbf16>
    %cst_42 = arith.constant dense<0.000000e+00> : vector<24x4xf32>
    %185 = tpu.matmul %184, %183, %cst_42 {dimension_numbers = #tpu.dot_dimension_numbers<[1], [0], [0], [1], [0, 0, 1, 1], [], []>} : vector<24x8xbf16>, vector<8x4xbf16>, vector<24x4xf32> -> vector<24x4xf32>
    %186 = vector.extract_strided_slice %185 {offsets = [0, 0], sizes = [8, 4], strides = [1, 1]} : vector<24x4xf32> to vector<8x4xf32>
    %187 = vector.extract_strided_slice %185 {offsets = [8, 0], sizes = [8, 4], strides = [1, 1]} : vector<24x4xf32> to vector<8x4xf32>
    %188 = vector.extract_strided_slice %185 {offsets = [16, 0], sizes = [8, 4], strides = [1, 1]} : vector<24x4xf32> to vector<8x4xf32>
    %189 = tpu.concatenate %186, %187, %188 in 1 : vector<8x4xf32>, vector<8x4xf32>, vector<8x4xf32> -> vector<8x12xf32>
    %190 = arith.truncf %189 : vector<8x12xf32> to vector<8x12xbf16>
    %c976 = arith.constant 976 : index
    %c0_43 = arith.constant 0 : index
    %191 = vector.load %arg2[%c976, %c0_43] : memref<1376x256xbf16, #tpu.memory_space<vmem>>, vector<12x128xbf16>
    %c40 = arith.constant 40 : index
    %c0_44 = arith.constant 0 : index
    %192 = vector.load %arg3[%c40, %c0_44] : memref<80x256xf32, #tpu.memory_space<vmem>>, vector<1x128xf32>
    %cst_45 = arith.constant dense<0.000000e+00> : vector<8x128xf32>
    %193 = tpu.matmul %190, %191, %cst_45 {dimension_numbers = #tpu.dot_dimension_numbers<[1], [0], [0], [1], [0, 0, 1, 1], [], []>} : vector<8x12xbf16>, vector<12x128xbf16>, vector<8x128xf32> -> vector<8x128xf32>
    %194 = vector.broadcast %192 : vector<1x128xf32> to vector<8x128xf32>
    %195 = arith.addf %193, %194 : vector<8x128xf32>
    %c48 = arith.constant 48 : index
    %c0_46 = arith.constant 0 : index
    %196 = vector.load %arg3[%c48, %c0_46] : memref<80x256xf32, #tpu.memory_space<vmem>>, vector<2x32xf32>
    %cst_47 = arith.constant dense<0.000000e+00> : vector<128xf32>
    %197 = vector.multi_reduction <add>, %195, %cst_47 [0] : vector<8x128xf32> to vector<128xf32>
    %198 = vector.shape_cast %197 : vector<128xf32> to vector<1x128xf32>
    %199 = arith.mulf %195, %195 : vector<8x128xf32>
    %cst_48 = arith.constant dense<0.000000e+00> : vector<128xf32>
    %200 = vector.multi_reduction <add>, %199, %cst_48 [0] : vector<8x128xf32> to vector<128xf32>
    %201 = vector.shape_cast %200 : vector<128xf32> to vector<1x128xf32>
    %202 = tpu.concatenate %198, %201 in 0 : vector<1x128xf32>, vector<1x128xf32> -> vector<2x128xf32>
    %203 = vector.extract_strided_slice %202 {offsets = [0, 0], sizes = [2, 32], strides = [1, 1]} : vector<2x128xf32> to vector<2x32xf32>
    %204 = vector.extract_strided_slice %202 {offsets = [0, 32], sizes = [2, 32], strides = [1, 1]} : vector<2x128xf32> to vector<2x32xf32>
    %205 = arith.addf %203, %204 : vector<2x32xf32>
    %206 = vector.extract_strided_slice %202 {offsets = [0, 64], sizes = [2, 32], strides = [1, 1]} : vector<2x128xf32> to vector<2x32xf32>
    %207 = arith.addf %205, %206 : vector<2x32xf32>
    %208 = vector.extract_strided_slice %202 {offsets = [0, 96], sizes = [2, 32], strides = [1, 1]} : vector<2x128xf32> to vector<2x32xf32>
    %209 = arith.addf %207, %208 : vector<2x32xf32>
    %210 = vector.extract_strided_slice %209 {offsets = [0, 0], sizes = [1, 32], strides = [1, 1]} : vector<2x32xf32> to vector<1x32xf32>
    %cst_49 = arith.constant 3.125000e-02 : f32
    %211 = vector.broadcast %cst_49 : f32 to vector<1x32xf32>
    %212 = arith.mulf %210, %211 : vector<1x32xf32>
    %213 = vector.extract_strided_slice %209 {offsets = [1, 0], sizes = [1, 32], strides = [1, 1]} : vector<2x32xf32> to vector<1x32xf32>
    %cst_50 = arith.constant 3.125000e-02 : f32
    %214 = vector.broadcast %cst_50 : f32 to vector<1x32xf32>
    %215 = arith.mulf %213, %214 : vector<1x32xf32>
    %216 = arith.mulf %212, %212 : vector<1x32xf32>
    %217 = arith.subf %215, %216 : vector<1x32xf32>
    %cst_51 = arith.constant 9.99999974E-6 : f32
    %218 = vector.broadcast %cst_51 : f32 to vector<1x32xf32>
    %219 = arith.addf %217, %218 : vector<1x32xf32>
    %220 = math.rsqrt %219 : vector<1x32xf32>
    %221 = vector.extract_strided_slice %196 {offsets = [0, 0], sizes = [1, 32], strides = [1, 1]} : vector<2x32xf32> to vector<1x32xf32>
    %222 = arith.mulf %221, %220 : vector<1x32xf32>
    %223 = vector.extract_strided_slice %196 {offsets = [1, 0], sizes = [1, 32], strides = [1, 1]} : vector<2x32xf32> to vector<1x32xf32>
    %224 = arith.mulf %212, %222 : vector<1x32xf32>
    %225 = arith.subf %223, %224 : vector<1x32xf32>
    %226 = tpu.concatenate %222, %225 in 0 : vector<1x32xf32>, vector<1x32xf32> -> vector<2x32xf32>
    %227 = tpu.concatenate %226, %226, %226, %226 in 1 : vector<2x32xf32>, vector<2x32xf32>, vector<2x32xf32>, vector<2x32xf32> -> vector<2x128xf32>
    %228 = vector.extract_strided_slice %227 {offsets = [0, 0], sizes = [1, 128], strides = [1, 1]} : vector<2x128xf32> to vector<1x128xf32>
    %229 = vector.broadcast %228 : vector<1x128xf32> to vector<8x128xf32>
    %230 = arith.mulf %195, %229 : vector<8x128xf32>
    %231 = vector.extract_strided_slice %227 {offsets = [1, 0], sizes = [1, 128], strides = [1, 1]} : vector<2x128xf32> to vector<1x128xf32>
    %232 = vector.broadcast %231 : vector<1x128xf32> to vector<8x128xf32>
    %233 = arith.addf %230, %232 : vector<8x128xf32>
    %cst_52 = arith.constant 0.000000e+00 : f32
    %234 = vector.broadcast %cst_52 : f32 to vector<8x128xf32>
    %235 = arith.maximumf %233, %234 : vector<8x128xf32>
    %236 = arith.truncf %235 : vector<8x128xf32> to vector<8x128xbf16>
    %c704 = arith.constant 704 : index
    %c0_53 = arith.constant 0 : index
    %237 = vector.load %arg1[%c704, %c0_53] : memref<1552x32xbf16, #tpu.memory_space<vmem>>, vector<48x8xbf16>
    %cst_54 = arith.constant dense<0.000000e+00> : vector<48x128xf32>
    %238 = tpu.matmul %237, %236, %cst_54 {dimension_numbers = #tpu.dot_dimension_numbers<[1], [0], [0], [1], [0, 0, 1, 1], [], []>} : vector<48x8xbf16>, vector<8x128xbf16>, vector<48x128xf32> -> vector<48x128xf32>
    %239 = vector.extract_strided_slice %238 {offsets = [0, 0], sizes = [16, 128], strides = [1, 1]} : vector<48x128xf32> to vector<16x128xf32>
    %240 = vector.extract_strided_slice %238 {offsets = [16, 0], sizes = [16, 128], strides = [1, 1]} : vector<48x128xf32> to vector<16x128xf32>
    %241 = vector.extract_strided_slice %238 {offsets = [32, 0], sizes = [16, 128], strides = [1, 1]} : vector<48x128xf32> to vector<16x128xf32>
    %242 = tpu.concatenate %239, %240, %241 in 1 : vector<16x128xf32>, vector<16x128xf32>, vector<16x128xf32> -> vector<16x384xf32>
    %243 = arith.truncf %242 : vector<16x384xf32> to vector<16x384xbf16>
    %c992 = arith.constant 992 : index
    %c0_55 = arith.constant 0 : index
    %244 = vector.load %arg2[%c992, %c0_55] : memref<1376x256xbf16, #tpu.memory_space<vmem>>, vector<384x128xbf16>
    %c56 = arith.constant 56 : index
    %c0_56 = arith.constant 0 : index
    %245 = vector.load %arg3[%c56, %c0_56] : memref<80x256xf32, #tpu.memory_space<vmem>>, vector<1x128xf32>
    %cst_57 = arith.constant dense<0.000000e+00> : vector<16x128xf32>
    %246 = tpu.matmul %243, %244, %cst_57 {dimension_numbers = #tpu.dot_dimension_numbers<[1], [0], [0], [1], [0, 0, 1, 1], [], []>} : vector<16x384xbf16>, vector<384x128xbf16>, vector<16x128xf32> -> vector<16x128xf32>
    %247 = vector.broadcast %245 : vector<1x128xf32> to vector<16x128xf32>
    %248 = arith.addf %246, %247 : vector<16x128xf32>
    %c64 = arith.constant 64 : index
    %c0_58 = arith.constant 0 : index
    %249 = vector.load %arg3[%c64, %c0_58] : memref<80x256xf32, #tpu.memory_space<vmem>>, vector<2x16xf32>
    %cst_59 = arith.constant dense<0.000000e+00> : vector<128xf32>
    %250 = vector.multi_reduction <add>, %248, %cst_59 [0] : vector<16x128xf32> to vector<128xf32>
    %251 = vector.shape_cast %250 : vector<128xf32> to vector<1x128xf32>
    %252 = arith.mulf %248, %248 : vector<16x128xf32>
    %cst_60 = arith.constant dense<0.000000e+00> : vector<128xf32>
    %253 = vector.multi_reduction <add>, %252, %cst_60 [0] : vector<16x128xf32> to vector<128xf32>
    %254 = vector.shape_cast %253 : vector<128xf32> to vector<1x128xf32>
    %255 = tpu.concatenate %251, %254 in 0 : vector<1x128xf32>, vector<1x128xf32> -> vector<2x128xf32>
    %256 = vector.extract_strided_slice %255 {offsets = [0, 0], sizes = [2, 16], strides = [1, 1]} : vector<2x128xf32> to vector<2x16xf32>
    %257 = vector.extract_strided_slice %255 {offsets = [0, 16], sizes = [2, 16], strides = [1, 1]} : vector<2x128xf32> to vector<2x16xf32>
    %258 = arith.addf %256, %257 : vector<2x16xf32>
    %259 = vector.extract_strided_slice %255 {offsets = [0, 32], sizes = [2, 16], strides = [1, 1]} : vector<2x128xf32> to vector<2x16xf32>
    %260 = arith.addf %258, %259 : vector<2x16xf32>
    %261 = vector.extract_strided_slice %255 {offsets = [0, 48], sizes = [2, 16], strides = [1, 1]} : vector<2x128xf32> to vector<2x16xf32>
    %262 = arith.addf %260, %261 : vector<2x16xf32>
    %263 = vector.extract_strided_slice %255 {offsets = [0, 64], sizes = [2, 16], strides = [1, 1]} : vector<2x128xf32> to vector<2x16xf32>
    %264 = arith.addf %262, %263 : vector<2x16xf32>
    %265 = vector.extract_strided_slice %255 {offsets = [0, 80], sizes = [2, 16], strides = [1, 1]} : vector<2x128xf32> to vector<2x16xf32>
    %266 = arith.addf %264, %265 : vector<2x16xf32>
    %267 = vector.extract_strided_slice %255 {offsets = [0, 96], sizes = [2, 16], strides = [1, 1]} : vector<2x128xf32> to vector<2x16xf32>
    %268 = arith.addf %266, %267 : vector<2x16xf32>
    %269 = vector.extract_strided_slice %255 {offsets = [0, 112], sizes = [2, 16], strides = [1, 1]} : vector<2x128xf32> to vector<2x16xf32>
    %270 = arith.addf %268, %269 : vector<2x16xf32>
    %271 = vector.extract_strided_slice %270 {offsets = [0, 0], sizes = [1, 16], strides = [1, 1]} : vector<2x16xf32> to vector<1x16xf32>
    %cst_61 = arith.constant 7.812500e-03 : f32
    %272 = vector.broadcast %cst_61 : f32 to vector<1x16xf32>
    %273 = arith.mulf %271, %272 : vector<1x16xf32>
    %274 = vector.extract_strided_slice %270 {offsets = [1, 0], sizes = [1, 16], strides = [1, 1]} : vector<2x16xf32> to vector<1x16xf32>
    %cst_62 = arith.constant 7.812500e-03 : f32
    %275 = vector.broadcast %cst_62 : f32 to vector<1x16xf32>
    %276 = arith.mulf %274, %275 : vector<1x16xf32>
    %277 = arith.mulf %273, %273 : vector<1x16xf32>
    %278 = arith.subf %276, %277 : vector<1x16xf32>
    %cst_63 = arith.constant 9.99999974E-6 : f32
    %279 = vector.broadcast %cst_63 : f32 to vector<1x16xf32>
    %280 = arith.addf %278, %279 : vector<1x16xf32>
    %281 = math.rsqrt %280 : vector<1x16xf32>
    %282 = vector.extract_strided_slice %249 {offsets = [0, 0], sizes = [1, 16], strides = [1, 1]} : vector<2x16xf32> to vector<1x16xf32>
    %283 = arith.mulf %282, %281 : vector<1x16xf32>
    %284 = vector.extract_strided_slice %249 {offsets = [1, 0], sizes = [1, 16], strides = [1, 1]} : vector<2x16xf32> to vector<1x16xf32>
    %285 = arith.mulf %273, %283 : vector<1x16xf32>
    %286 = arith.subf %284, %285 : vector<1x16xf32>
    %287 = tpu.concatenate %283, %286 in 0 : vector<1x16xf32>, vector<1x16xf32> -> vector<2x16xf32>
    %288 = tpu.concatenate %287, %287, %287, %287, %287, %287, %287, %287 in 1 : vector<2x16xf32>, vector<2x16xf32>, vector<2x16xf32>, vector<2x16xf32>, vector<2x16xf32>, vector<2x16xf32>, vector<2x16xf32>, vector<2x16xf32> -> vector<2x128xf32>
    %289 = vector.extract_strided_slice %288 {offsets = [0, 0], sizes = [1, 128], strides = [1, 1]} : vector<2x128xf32> to vector<1x128xf32>
    %290 = vector.broadcast %289 : vector<1x128xf32> to vector<16x128xf32>
    %291 = arith.mulf %248, %290 : vector<16x128xf32>
    %292 = vector.extract_strided_slice %288 {offsets = [1, 0], sizes = [1, 128], strides = [1, 1]} : vector<2x128xf32> to vector<1x128xf32>
    %293 = vector.broadcast %292 : vector<1x128xf32> to vector<16x128xf32>
    %294 = arith.addf %291, %293 : vector<16x128xf32>
    %cst_64 = arith.constant 0.000000e+00 : f32
    %295 = vector.broadcast %cst_64 : f32 to vector<16x128xf32>
    %296 = arith.maximumf %294, %295 : vector<16x128xf32>
    %297 = arith.truncf %296 : vector<16x128xf32> to vector<16x128xbf16>
    %c752 = arith.constant 752 : index
    %c0_65 = arith.constant 0 : index
    %298 = vector.load %arg1[%c752, %c0_65] : memref<1552x32xbf16, #tpu.memory_space<vmem>>, vector<160x16xbf16>
    %cst_66 = arith.constant dense<0.000000e+00> : vector<160x128xf32>
    %299 = tpu.matmul %298, %297, %cst_66 {dimension_numbers = #tpu.dot_dimension_numbers<[1], [0], [0], [1], [0, 0, 1, 1], [], []>} : vector<160x16xbf16>, vector<16x128xbf16>, vector<160x128xf32> -> vector<160x128xf32>
    %300 = vector.extract_strided_slice %299 {offsets = [0, 0], sizes = [32, 128], strides = [1, 1]} : vector<160x128xf32> to vector<32x128xf32>
    %301 = vector.extract_strided_slice %299 {offsets = [32, 0], sizes = [32, 128], strides = [1, 1]} : vector<160x128xf32> to vector<32x128xf32>
    %302 = vector.extract_strided_slice %299 {offsets = [64, 0], sizes = [32, 128], strides = [1, 1]} : vector<160x128xf32> to vector<32x128xf32>
    %303 = vector.extract_strided_slice %299 {offsets = [96, 0], sizes = [32, 128], strides = [1, 1]} : vector<160x128xf32> to vector<32x128xf32>
    %304 = vector.extract_strided_slice %299 {offsets = [128, 0], sizes = [32, 128], strides = [1, 1]} : vector<160x128xf32> to vector<32x128xf32>
    %305 = tpu.concatenate %300, %301, %302, %303, %304 in 1 : vector<32x128xf32>, vector<32x128xf32>, vector<32x128xf32>, vector<32x128xf32>, vector<32x128xf32> -> vector<32x640xf32>
    %306 = arith.truncf %305 : vector<32x640xf32> to vector<32x640xbf16>
    %c912 = arith.constant 912 : index
    %c0_67 = arith.constant 0 : index
    %307 = vector.load %arg1[%c912, %c0_67] : memref<1552x32xbf16, #tpu.memory_space<vmem>>, vector<640x16xbf16>
    %c72 = arith.constant 72 : index
    %c0_68 = arith.constant 0 : index
    %308 = vector.load %arg3[%c72, %c0_68] : memref<80x256xf32, #tpu.memory_space<vmem>>, vector<1x16xf32>
    %cst_69 = arith.constant dense<0.000000e+00> : vector<32x16xf32>
    %309 = tpu.matmul %306, %307, %cst_69 {dimension_numbers = #tpu.dot_dimension_numbers<[1], [0], [0], [1], [0, 0, 1, 1], [], []>} : vector<32x640xbf16>, vector<640x16xbf16>, vector<32x16xf32> -> vector<32x16xf32>
    %310 = vector.broadcast %308 : vector<1x16xf32> to vector<32x16xf32>
    %311 = arith.addf %309, %310 : vector<32x16xf32>
    %312 = arith.negf %311 : vector<32x16xf32>
    %313 = math.exp %312 : vector<32x16xf32>
    %cst_70 = arith.constant 1.000000e+00 : f32
    %314 = vector.broadcast %cst_70 : f32 to vector<32x16xf32>
    %315 = arith.addf %314, %313 : vector<32x16xf32>
    %316 = arith.divf %314, %315 : vector<32x16xf32>
    %c0_71 = arith.constant 0 : index
    %c0_72 = arith.constant 0 : index
    %317 = vector.load %arg4[%c0_71, %c0_72] : memref<32x16xf32, #tpu.memory_space<vmem>>, vector<32x16xf32>
    tpu.vector_store %arg4[%c0_71, %c0_72], %316 {strides = array<i32>} : memref<32x16xf32, #tpu.memory_space<vmem>>, vector<32x16xf32>,
    return
  }
}

</mosaic_0001>

<bundles_post_ra>
// kernel: fwd.1
= control target key start
LH: loop header
LB: loop body
LE: loop exit
PB: predicated region body
PF: predicated region fallthrough
CT: control target
= control target key end

     0   :  { %9 = vsyncpa [#allocation3], 0  ;;  %s5372_s0 = inlined_call_operand.vmem [shape: f32[32,16], index: 0, kind: input, shape index: {}]   ;;  %s5373_s1 = inlined_call_operand.vmem [shape: bf16[1552,32], index: 1, kind: input, shape index: {}]   ;;  %s5374_s2 = inlined_call_operand.hbm [shape: bf16[1376,256], index: 2, kind: input, shape index: {}]   ;;  %s5375_s3 = inlined_call_operand.vmem [shape: f32[80,256], index: 3, kind: input, shape index: {}]   ;;  %s5376_s4 = inlined_call_operand.hbm [shape: f32[32,16], index: 4, kind: output, shape index: {}]  }
   0x1   :  { %10 = vsyncpa [#allocation4], 0  ;;  %s4675_s15 = smov [#allocation2]  }
   0x2   :  { %s20_s16 = sshll.u32 %s4675_s15, 4  ;;  %s21_s16 = int_to_ptr.vmem [resolvable:$true] %s20_s16 }
   0x3   :  { %s4639_s17 = scalar_lea.vmem %s21_s16, 22016  ;;  %p4644_p1 = scmp.lt.s32.totalorder %s21_s16, %s21_s16 }
   0x4   :  { %p4640_p0 = scmp.ne.s32.totalorder %s21_s16, %s4639_s17  ;;  %p4645_p2 = scmp.lt.s32.totalorder %s4639_s17, %s4639_s17 }
   0x6   :  { %p4646_p3 = por %p4645_p2, %p4644_p1 }
   0x8   :  { %p4647_p4 = pnand %p4646_p3, %p4640_p0 }
   0xa   :  { %4650 = shalt.err (!%p4647_p4)
}
   0xb   :  { %s4676_s18 = smov 128   ;;  %s4677_s19 = smov 8  }
   0xc   :  { %26 = dma.hbm_to_vmem [thread:$0]  %s5374_s2, 22016, %s21_s16, [#allocation3], %s4676_s18, %s4676_s18, %s4677_s19  }
   0xd   :  { %4671 = dma.done.wait [#allocation3], 22016  }
   0xe   :  { %4672 = vsyncadd [#allocation3], 4294945280  ;;  %v35_v0 = vld [vmem:[%s5372_s0 + $0x10] sm:$0xff]  ;;  %v36_v1 = vld [vmem:[%s5372_s0 + $0x18] sm:$0xff]  ;;  %vm109_vm0 = vcmask 261120   ;;  %s4678_s24 = smov 16  }
   0xf   :  { %v33_v2 = vld [vmem:[%s5372_s0] sm:$0xff]  ;;  %v38_v3 = vpack.c.bf16 %v36_v1, %v35_v0  ;;  %v34_v4 = vld [vmem:[%s5372_s0 + $0x8] sm:$0xff]  ;;  %v4300_v8 = vld [vmem:[%s5373_s1 + $0x10] sm:$0xff]   ;;  %s4679_s25 = smov 32   ;;  %v4680_v48 = vmov 0   ;;  %s4681_s26 = smov 48  }
  0x10   :  { %v37_v5 = vpack.c.bf16 %v34_v4, %v33_v2  ;;  %v4298_v6 = vld [vmem:[%s5373_s1] sm:$0xff]   ;;  %v4299_v7 = vld [vmem:[%s5373_s1 + $0x8] sm:$0xff]   ;;  %v4301_v9 = vld [vmem:[%s5373_s1 + $0x18] sm:$0xff]   ;;  %449 = vmatprep.mubr.bf16.mxu1 %v4680_v48  ;;  %s4682_s27 = smov 64   ;;  %vm317_vm1 = vcmask 130048   ;;  %vm326_vm2 = vcmask 392192  }
  0x11   :  { %4089 = vmatprep.subr.bf16.mxu0 %v38_v3  ;;  %4093 = vmatprep.mubr.msk.bf16.mxu0 %vm109_vm0, %v4298_v6  ;;  %v4302_v10 = vld [vmem:[%s5373_s1 + $0x20] sm:$0xff]   ;;  %v4303_v11 = vld [vmem:[%s5373_s1 + $0x28] sm:$0xff]   ;;  %v4304_v12 = vld [vmem:[%s5373_s1 + $0x30] sm:$0xff]   ;;  %vm331_vm3 = vcmask 523264   ;;  %vm410_vm4 = vcmask 654336   ;;  %vm515_vm5 = vcmask 1040384  }
  0x12   :  { %4090 = vmatpush3.bf16.msra.mxu0 %v38_v3  ;;  %v4305_v13 = vld [vmem:[%s5373_s1 + $0x38] sm:$0xff]   ;;  %v4306_v14 = vld [vmem:[%s5373_s1 + $0x40] sm:$0xff]   ;;  %v4307_v15 = vld [vmem:[%s5373_s1 + $0x48] sm:$0xff]   ;;  %s4683_s2 = smov 96   ;;  %s4684_s30 = smov 112   ;;  %vm622_vm6 = vcmask 785408  }
  0x13   :  { %4091 = vmatprep.subr.bf16.mxu0 %v37_v5  ;;  %v4308_v22 = vld [vmem:[#allocation2 + $0x44] ss:$8 sps:$4 sm:$0xff]   ;;  %v4310_v24 = vld [vmem:[#allocation2 + $0x40] ss:$8 sps:$4 sm:$0xff]   ;;  %v4311_v27 = vld [vmem:[#allocation2 + $0x34] ss:$8 sps:$4 sm:$0xff]  }
  0x14   :  { %423 = vmatprep.subr.bf16.mxu1 %v4308_v22  ;;  %v4313_v29 = vld [vmem:[#allocation2 + $0x30] ss:$8 sps:$4 sm:$0xff]   ;;  %v4314_v31 = vld [vmem:[#allocation2 + $0x24] ss:$8 sps:$4 sm:$0xff]   ;;  %v4316_v33 = vld [vmem:[#allocation2 + $0x20] ss:$8 sps:$4 sm:$0xff]  }
  0x15   :  { %424 = vmatpush1.bf16.msra.mxu1 %v4310_v24  ;;  %v4317_v35 = vld [vmem:[#allocation2 + $0x14] ss:$8 sps:$4 sm:$0xff]   ;;  %v4319_v36 = vld [vmem:[#allocation2 + $0x10] ss:$8 sps:$4 sm:$0xff]   ;;  %v4320_v41 = vld [vmem:[#allocation2 + $0x4] ss:$8 sps:$4 sm:$0xff]  }
  0x16   :  { %4092 = vmatpush3.bf16.msra.mxu0 %v37_v5  ;;  %425 = vmatprep.subr.bf16.mxu1 %v4311_v27  ;;  %v4322_v43 = vld [vmem:[#allocation2] ss:$8 sps:$4 sm:$0xff]   ;;  %s4685_s5 = smov 80   ;;  %vm624_vm7 = vcmask 916480   ;;  %vm4687_vm8 = vmmov 0   ;;  %vm1874_vm9 = vcmask 64512  }
  0x17   :  { %vm1881_vm10 = vcmask 1043456   ;;  %vm2308_vm11 = vcmask 1045504   ;;  %s4688_s6 = smov 4   ;;  %vm2292_vm12 = vcmask 31744   ;;  %vm2304_vm13 = vcmask 97280  }
  0x19   :  { %4094 = vmatmul.mubr.msk.bf16.vlgmr.msra.gmra.mxu0 %vm109_vm0, %v4299_v7  ;;  %426 = vmatpush1.bf16.msra.mxu1 %v4313_v29 }
  0x1a   :  { %4097 = vmatprep.mubr.msk.bf16.mxu0 %vm109_vm0, %v4300_v8  ;;  %427 = vmatprep.subr.bf16.mxu1 %v4314_v31 }
  0x1d   :  { %428 = vmatpush1.bf16.msra.mxu1 %v4316_v33  ;;  %v350_v33 = vlaneseq }
  0x1e   :  { %429 = vmatprep.subr.bf16.mxu1 %v4317_v35 }
  0x21   :  { %4098 = vmatmul.mubr.msk.bf16.gmra.mxu0 %vm109_vm0, %v4301_v9  ;;  %430 = vmatpush1.bf16.msra.mxu1 %v4319_v36  ;;  %v348_v36 = vld [vmem:[%s5375_s3] ss:$8 sm:$0x3] }
  0x22   :  { %4101 = vmatprep.mubr.msk.bf16.mxu0 %vm109_vm0, %v4302_v10  ;;  %431 = vmatprep.subr.bf16.mxu1 %v4320_v41 }
  0x25   :  { %432 = vmatpush1.bf16.msra.mxu1 %v4322_v43 }
  0x29   :  { %4102 = vmatmul.mubr.msk.bf16.gmra.mxu0 %vm109_vm0, %v4303_v11 }
  0x2a   :  { %4105 = vmatprep.mubr.msk.bf16.mxu0 %vm109_vm0, %v4304_v12 }
  0x31   :  { %4106 = vmatmul.mubr.msk.bf16.gmra.mxu0 %vm109_vm0, %v4305_v13 }
  0x32   :  { %4109 = vmatprep.mubr.msk.bf16.mxu0 %vm109_vm0, %v4306_v14 }
  0x39   :  { %4110 = vmatmul.mubr.msk.bf16.gmra.mxu0 %vm109_vm0, %v4307_v15 }
  0xd9   :  { %v4773_v16 = vpop.f32.mrf.mxu0 }
  0xdb   :  { %v4775_v17 = vpop.f32.mrf.mxu0 }
  0xdd   :  { %v4777_v18 = vpop.f32.mrf.mxu0 }
  0xdf   :  { %v4779_v19 = vpop.f32.mrf.mxu0 }
  0xe1   :  { %v4099_v20 = vpop.f32.mrf.mxu0 }
  0xe3   :  { %v190_v21 = vpop.f32.mrf.mxu0 }
  0xe5   :  { %v4100_v23 = vpop.f32.mrf.mxu0 }
  0xe6   :  { %v4268_v40 = vpack.i.bf16 %v4100_v23, %v4099_v20 }
  0xe7   :  { %v193_v25 = vpop.f32.mrf.mxu0 }
  0xe8   :  { %v4258_v26 = vpack.i.bf16 %v193_v25, %v190_v21 }
  0xe9   :  { %v4103_v28 = vpop.f32.mrf.mxu0 }
  0xea   :  { %4259 = vrot.lane.b32.xlu0 %v4258_v26, %s4678_s24 }
  0xeb   :  { %v206_v30 = vpop.f32.mrf.mxu0 }
  0xed   :  { %v4104_v32 = vpop.f32.mrf.mxu0 }
  0xee   :  { %v4283_v53 = vpack.i.bf16 %v4104_v32, %v4103_v28 }
  0xef   :  { %v209_v34 = vpop.f32.mrf.mxu0 }
  0xf0   :  { %v4263_v37 = vpack.i.bf16 %v209_v34, %v206_v30  ;;  %v351_v34 = vshrl.u32 %v350_v33, 7 }
  0xf1   :  { %v4107_v38 = vpop.f32.mrf.mxu0 }
  0xf2   :  { %4264 = vrot.lane.b32.xlu0 %v4263_v37, %s4679_s25  ;;  %v4814_v35 = vsub.s32 0, %v351_v34 }
  0xf3   :  { %v222_v39 = vpop.f32.mrf.mxu0 }
  0xf5   :  { %v4108_v42 = vpop.f32.mrf.mxu0 }
  0xf6   :  { %4269 = vrot.lane.b32.xlu0 %v4268_v40, %s4678_s24  ;;  %v4288_v45 = vpack.i.bf16 %v4108_v42, %v4107_v38  ;;  %v4819_v38 = vsub.s32 1, %v351_v34 }
  0xf7   :  { %v225_v44 = vpop.f32.mrf.mxu0 }
  0xf8   :  { %v4273_v46 = vpack.i.bf16 %v225_v44, %v222_v39  ;;  %v353_v39 = vrot.slane %v348_v36, %v4814_v35  ;;  %v357_v41 = vrot.slane %v348_v36, %v4819_v38 }
  0xf9   :  { %v4111_v47 = vpop.f32.mrf.mxu0 }
  0xfa   :  { %4289 = vrot.lane.b32.xlu0 %v4288_v45, %s4681_s26  ;;  %4274 = vrot.lane.b32.xlu1 %v4273_v46, %s4681_s26 }
  0xfb   :  { %v238_v49 = vpop.f32.mrf.mxu0 }
  0xfd   :  { %v4112_v50 = vpop.f32.mrf.mxu0 }
  0xfe   :  { %v4293_v54 = vpack.i.bf16 %v4112_v50, %v4111_v47 }
  0xff   :  { %v241_v51 = vpop.f32.mrf.mxu0 }
 0x100   :  { %v4278_v52 = vpack.i.bf16 %v241_v51, %v238_v49 }
 0x102   :  { %4279 = vrot.lane.b32.xlu1 %v4278_v52, %s4682_s27 }
 0x106   :  { %4284 = vrot.lane.b32.xlu1 %v4283_v53, %s4679_s25 }
 0x10a   :  { %4294 = vrot.lane.b32.xlu1 %v4293_v54, %s4682_s27 }
 0x15c   :  { %v4260_v55 = vpop.permute.xlu0 %4259 }
 0x15d   :  { %v4262_v58 = vunpack.i.h.bf16 %v4260_v55  ;;  %v4261_v59 = vunpack.i.l.bf16 %v4260_v55 }
 0x15f   :  { %v319_v1 = vsel %vm317_vm1, %v4779_v19, %v4262_v58  ;;  %v318_v2 = vsel %vm317_vm1, %v4775_v17, %v4261_v59 }
 0x164   :  { %v4265_v56 = vpop.permute.xlu0 %4264 }
 0x165   :  { %v4267_v60 = vunpack.i.h.bf16 %v4265_v56  ;;  %v4266_v61 = vunpack.i.l.bf16 %v4265_v56 }
 0x167   :  { %v323_v4 = vsel %vm109_vm0, %v319_v1, %v4267_v60  ;;  %v322_v5 = vsel %vm109_vm0, %v318_v2, %v4266_v61 }
 0x168   :  { %v4270_v0 = vpop.permute.xlu0 %4269 }
 0x169   :  { %v4272_v8 = vunpack.i.h.bf16 %v4270_v0  ;;  %v4271_v9 = vunpack.i.l.bf16 %v4270_v0 }
 0x16b   :  { %v321_v21 = vsel %vm317_vm1, %v4777_v18, %v4272_v8  ;;  %v320_v22 = vsel %vm317_vm1, %v4773_v16, %v4271_v9 }
 0x16c   :  { %v4275_v57 = vpop.permute.xlu1 %4274  ;;  %v4290_v17 = vpop.permute.xlu0 %4289 }
 0x16d   :  { %v4277_v62 = vunpack.i.h.bf16 %v4275_v57  ;;  %v4276_v63 = vunpack.i.l.bf16 %v4275_v57  ;;  %v4292_v25 = vunpack.i.h.bf16 %v4290_v17  ;;  %v4291_v26 = vunpack.i.l.bf16 %v4290_v17 }
 0x16f   :  { %v328_v10 = vsel %vm326_vm2, %v323_v4, %v4277_v62  ;;  %v327_v11 = vsel %vm326_vm2, %v322_v5, %v4276_v63 }
 0x174   :  { %v4280_v3 = vpop.permute.xlu1 %4279 }
 0x175   :  { %v4282_v6 = vunpack.i.h.bf16 %v4280_v3  ;;  %v4281_v7 = vunpack.i.l.bf16 %v4280_v3 }
 0x177   :  { %v333_v12 = vsel %vm331_vm3, %v328_v10, %v4282_v6  ;;  %v332_v13 = vsel %vm331_vm3, %v327_v11, %v4281_v7 }
 0x178   :  { %v336_v14 = vpack.c.bf16 %v333_v12, %v332_v13  ;;  %v4285_v15 = vpop.permute.xlu1 %4284 }
 0x179   :  { %v4287_v19 = vunpack.i.h.bf16 %v4285_v15  ;;  %v4286_v20 = vunpack.i.l.bf16 %v4285_v15 }
 0x17a   :  { %3666 = vmatmul.mubr.msk.bf16.vlgmr.msra.gmra.mxu1 %vm410_vm4, %v336_v14 }
 0x17b   :  { %v325_v23 = vsel %vm109_vm0, %v321_v21, %v4287_v19  ;;  %v324_v24 = vsel %vm109_vm0, %v320_v22, %v4286_v20  ;;  %459 = vmatprep.mubr.bf16.mxu1 %v4680_v48 }
 0x17c   :  { %v4295_v27 = vpop.permute.xlu1 %4294  ;;  %v329_v30 = vsel %vm326_vm2, %v324_v24, %v4291_v26  ;;  %v330_v18 = vsel %vm326_vm2, %v325_v23, %v4292_v25 }
 0x17d   :  { %v4297_v28 = vunpack.i.h.bf16 %v4295_v27  ;;  %v4296_v29 = vunpack.i.l.bf16 %v4295_v27 }
 0x17f   :  { %v334_v31 = vsel %vm331_vm3, %v329_v30, %v4296_v29  ;;  %v335_v16 = vsel %vm331_vm3, %v330_v18, %v4297_v28 }
 0x180   :  { %v337_v32 = vpack.c.bf16 %v335_v16, %v334_v31 }
 0x182   :  { %3667 = vmatmul.mubr.msk.bf16.gmra.mxu1 %vm410_vm4, %v337_v32 }
 0x183   :  { %746 = vmatprep.mubr.bf16.mxu1 %v4680_v48 }
 0x23a   :  { %v451_v37 = vpop.f32.mrf.mxu1 }
 0x23b   :  { %v4825_v44 = vadd.f32 %v451_v37, %v353_v39 }
 0x23c   :  { %v453_v40 = vpop.f32.mrf.mxu1 }
 0x23d   :  { %v4829_v47 = vadd.f32 %v453_v40, %v357_v41  ;;  %v489_v52 = vmul.f32 %v4825_v44, %v4825_v44 }
 0x23e   :  { %v455_v42 = vpop.f32.mrf.mxu1 }
 0x23f   :  { %v4823_v43 = vadd.f32 %v455_v42, %v353_v39  ;;  %v490_v58 = vmul.f32 %v4829_v47, %v4829_v47 }
 0x240   :  { %v457_v45 = vpop.f32.mrf.mxu1 }
 0x241   :  { %v4827_v46 = vadd.f32 %v457_v45, %v357_v41  ;;  %v491_v49 = vmul.f32 %v4823_v43, %v4823_v43  ;;  %v471_v55 = vadd.f32 %v4823_v43, %v4825_v44 }
 0x242   :  { %v461_v50 = vpop.f32.mrf.mxu1 }
 0x243   :  { %v4833_v51 = vadd.f32 %v461_v50, %v353_v39  ;;  %v492_v53 = vmul.f32 %v4827_v46, %v4827_v46  ;;  %v497_v59 = vadd.f32 %v491_v49, %v489_v52  ;;  %v480_v61 = vadd.f32 %v4827_v46, %v4829_v47 }
 0x244   :  { %v463_v54 = vpop.f32.mrf.mxu1 }
 0x245   :  { %v493_v56 = vmul.f32 %v4833_v51, %v4833_v51  ;;  %v4843_v57 = vadd.f32 %v463_v54, %v357_v41  ;;  %v472_v62 = vadd.f32 %v471_v55, %v4833_v51  ;;  %v506_v1 = vadd.f32 %v492_v53, %v490_v58 }
 0x246   :  { %v465_v60 = vpop.f32.mrf.mxu1 }
 0x247   :  { %v494_v63 = vmul.f32 %v4843_v57, %v4843_v57  ;;  %v4852_v0 = vadd.f32 %v465_v60, %v353_v39  ;;  %v498_v2 = vadd.f32 %v497_v59, %v493_v56  ;;  %v481_v4 = vadd.f32 %v480_v61, %v4843_v57 }
 0x248   :  { %v467_v3 = vpop.f32.mrf.mxu1 }
 0x249   :  { %v473_v5 = vadd.f32 %v472_v62, %v4852_v0  ;;  %v495_v6 = vmul.f32 %v4852_v0, %v4852_v0  ;;  %v4858_v7 = vadd.f32 %v467_v3, %v357_v41  ;;  %v507_v8 = vadd.f32 %v506_v1, %v494_v63 }
 0x24b   :  { %v474_v9 = vrot.slane %v473_v5, 4  ;;  %v499_v10 = vadd.f32 %v498_v2, %v495_v6  ;;  %v482_v11 = vadd.f32 %v481_v4, %v4858_v7  ;;  %v496_v12 = vmul.f32 %v4858_v7, %v4858_v7 }
 0x24d   :  { %v475_v13 = vadd.f32 %v474_v9, %v473_v5  ;;  %v500_v14 = vrot.slane %v499_v10, 4  ;;  %v508_v15 = vadd.f32 %v507_v8, %v496_v12  ;;  %v483_v20 = vrot.slane %v482_v11, 4 }
 0x24f   :  { %v476_v17 = vrot.slane %v475_v13, 2  ;;  %v501_v19 = vadd.f32 %v500_v14, %v499_v10  ;;  %v509_v21 = vrot.slane %v508_v15, 4  ;;  %v484_v27 = vadd.f32 %v483_v20, %v482_v11 }
 0x251   :  { %v477_v22 = vadd.f32 %v476_v17, %v475_v13  ;;  %v502_v23 = vrot.slane %v501_v19, 2  ;;  %v510_v24 = vadd.f32 %v509_v21, %v508_v15  ;;  %v485_v31 = vrot.slane %v484_v27, 2 }
 0x253   :  { %v478_v25 = vrot.slane %v477_v22, 1  ;;  %v503_v26 = vadd.f32 %v502_v23, %v501_v19  ;;  %v511_v29 = vrot.slane %v510_v24, 2  ;;  %v486_v33 = vadd.f32 %v485_v31, %v484_v27  ;;  %v470_v23 = vld [vmem:[%s5375_s3 + $0x10] sm:$0x3]  ;;  %v4330_v31 = vld [vmem:[#allocation2 + $0xb4] ss:$8 sps:$4 sm:$0xff]  }
 0x255   :  { %v504_v28 = vrot.slane %v503_v26, 1  ;;  %v479_v30 = vadd.f32 %v478_v25, %v477_v22  ;;  %v512_v16 = vadd.f32 %v511_v29, %v510_v24  ;;  %v487_v36 = vrot.slane %v486_v33, 1 }
 0x257   :  { %v505_v18 = vadd.f32 %v504_v28, %v503_v26  ;;  %v513_v34 = vrot.slane %v512_v16, 1  ;;  %v488_v39 = vadd.f32 %v487_v36, %v486_v33  ;;  %v4331_v33 = vld [vmem:[#allocation2 + $0xa0] ss:$8 sps:$4 sm:$0xff]   ;;  %v4334_v36 = vld [vmem:[#allocation2 + $0x90] ss:$8 sps:$4 sm:$0xff]  }
 0x259   :  { %v516_v32 = vsel %vm515_vm5, %v479_v30, %v505_v18  ;;  %v514_v37 = vadd.f32 %v513_v34, %v512_v16  ;;  %v4325_v30 = vld [vmem:[#allocation2 + $0xc0] ss:$8 sps:$4 sm:$0xff]   ;;  %v4327_v18 = vld [vmem:[#allocation2 + $0xc4] ss:$8 sps:$4 sm:$0xff]   ;;  %v4328_v16 = vld [vmem:[#allocation2 + $0xb0] ss:$8 sps:$4 sm:$0xff]  }
 0x25a   :  { %523 = vrot.lane.b32.xlu1 %v516_v32, %s4683_s2  ;;  %519 = vrot.lane.b32.xlu0 %v516_v32, %s4684_s30  ;;  %v4336_v34 = vld [vmem:[#allocation2 + $0x94] ss:$8 sps:$4 sm:$0xff]  }
 0x25b   :  { %v517_v40 = vsel %vm515_vm5, %v488_v39, %v514_v37  ;;  %933 = vmatprep.subr.bf16.mxu0 %v4327_v18  ;;  %v4339_v37 = vld [vmem:[#allocation2 + $0x84] ss:$8 sps:$4 sm:$0xff]   ;;  %v4337_v39 = vld [vmem:[#allocation2 + $0x80] ss:$8 sps:$4 sm:$0xff]  }
 0x25c   :  { %934 = vmatpush1.bf16.msra.mxu0 %v4325_v30 }
 0x25d   :  { %935 = vmatprep.subr.bf16.mxu0 %v4330_v31 }
 0x25e   :  { %531 = vrot.lane.b32.xlu1 %v516_v32, %s4682_s27  ;;  %527 = vrot.lane.b32.xlu0 %v516_v32, %s4685_s5 }
 0x260   :  { %936 = vmatpush1.bf16.msra.mxu0 %v4328_v16 }
 0x262   :  { %539 = vrot.lane.b32.xlu1 %v516_v32, %s4679_s25  ;;  %535 = vrot.lane.b32.xlu0 %v516_v32, %s4681_s26 }
 0x266   :  { %549 = vrot.lane.b32.xlu1 %v517_v40, %s4684_s30  ;;  %543 = vrot.lane.b32.xlu0 %v516_v32, %s4678_s24 }
 0x26a   :  { %557 = vrot.lane.b32.xlu1 %v517_v40, %s4685_s5  ;;  %553 = vrot.lane.b32.xlu0 %v517_v40, %s4683_s2 }
 0x26e   :  { %565 = vrot.lane.b32.xlu1 %v517_v40, %s4681_s26  ;;  %561 = vrot.lane.b32.xlu0 %v517_v40, %s4682_s27 }
 0x272   :  { %573 = vrot.lane.b32.xlu1 %v517_v40, %s4678_s24  ;;  %569 = vrot.lane.b32.xlu0 %v517_v40, %s4679_s25 }
 0x2cc   :  { %v524_v41 = vpop.permute.xlu1 %523  ;;  %v520_v42 = vpop.permute.xlu0 %519 }
 0x2cd   :  { %v522_v45 = vadd.f32 %v520_v42, %v516_v32  ;;  %v4333_v32 = vld [vmem:[#allocation2 + $0xa4] ss:$8 sps:$4 sm:$0xff]  }
 0x2ce   :  { %937 = vmatprep.subr.bf16.mxu0 %v4333_v32  ;;  %v4345_v42 = vld [vmem:[#allocation2 + $0x64] ss:$8 sps:$4 sm:$0xff]  }
 0x2cf   :  { %v526_v49 = vadd.f32 %v524_v41, %v522_v45  ;;  %938 = vmatpush1.bf16.msra.mxu0 %v4331_v33  ;;  %v4340_v41 = vld [vmem:[#allocation2 + $0x70] ss:$8 sps:$4 sm:$0xff]   ;;  %v4343_v45 = vld [vmem:[#allocation2 + $0x60] ss:$8 sps:$4 sm:$0xff]  }
 0x2d0   :  { %v532_v50 = vpop.permute.xlu1 %531  ;;  %v528_v52 = vpop.permute.xlu0 %527  ;;  %939 = vmatprep.subr.bf16.mxu0 %v4336_v34  ;;  %v4323_v33 = vld [vmem:[%s5373_s1 + $0x50] sm:$0xff]   ;;  %v4324_v34 = vld [vmem:[%s5373_s1 + $0x58] sm:$0xff]  }
 0x2d1   :  { %v530_v53 = vadd.f32 %v528_v52, %v526_v49  ;;  %v4348_v49 = vld [vmem:[#allocation2 + $0x54] ss:$8 sps:$4 sm:$0xff]   ;;  %v4351_v52 = vld [vmem:[#allocation2 + $0x144] ss:$8 sps:$4 sm:$0xff]  }
 0x2d3   :  { %v534_v54 = vadd.f32 %v532_v50, %v530_v53  ;;  %940 = vmatpush1.bf16.msra.mxu0 %v4334_v36  ;;  %v4346_v50 = vld [vmem:[#allocation2 + $0x50] ss:$8 sps:$4 sm:$0xff]   ;;  %v4349_v53 = vld [vmem:[#allocation2 + $0x140] ss:$8 sps:$4 sm:$0xff]   ;;  %v4360_v36 = vld [vmem:[#allocation2 + $0x114] ss:$8 sps:$4 sm:$0xff]  }
 0x2d4   :  { %v540_v55 = vpop.permute.xlu1 %539  ;;  %v536_v56 = vpop.permute.xlu0 %535  ;;  %941 = vmatprep.subr.bf16.mxu0 %v4339_v37  ;;  %v4358_v37 = vld [vmem:[#allocation2 + $0x110] ss:$8 sps:$4 sm:$0xff]  }
 0x2d5   :  { %v538_v58 = vadd.f32 %v536_v56, %v534_v54  ;;  %v4354_v54 = vld [vmem:[#allocation2 + $0x134] ss:$8 sps:$4 sm:$0xff]   ;;  %v4357_v56 = vld [vmem:[#allocation2 + $0x124] ss:$8 sps:$4 sm:$0xff]  }
 0x2d7   :  { %v542_v59 = vadd.f32 %v540_v55, %v538_v58  ;;  %942 = vmatpush1.bf16.msra.mxu0 %v4337_v39  ;;  %v4352_v55 = vld [vmem:[#allocation2 + $0x130] ss:$8 sps:$4 sm:$0xff]   ;;  %v4355_v58 = vld [vmem:[#allocation2 + $0x120] ss:$8 sps:$4 sm:$0xff]   ;;  %v4363_v39 = vld [vmem:[#allocation2 + $0x104] ss:$8 sps:$4 sm:$0xff]  }
 0x2d8   :  { %v550_v60 = vpop.permute.xlu1 %549  ;;  %v544_v61 = vpop.permute.xlu0 %543 }
 0x2d9   :  { %v546_v62 = vadd.f32 %v544_v61, %v542_v59 }
 0x2db   :  { %v547_v63 = vadd.f32 %v546_v62, %v517_v40  ;;  %v4342_v40 = vld [vmem:[#allocation2 + $0x74] ss:$8 sps:$4 sm:$0xff]  }
 0x2dc   :  { %v558_v1 = vpop.permute.xlu1 %557  ;;  %v554_v2 = vpop.permute.xlu0 %553  ;;  %943 = vmatprep.subr.bf16.mxu0 %v4342_v40  ;;  %v4361_v40 = vld [vmem:[#allocation2 + $0x100] ss:$8 sps:$4 sm:$0xff]  }
 0x2dd   :  { %v552_v3 = vadd.f32 %v550_v60, %v547_v63  ;;  %944 = vmatpush1.bf16.msra.mxu0 %v4340_v41  ;;  %v4366_v41 = vld [vmem:[#allocation2 + $0xf4] ss:$8 sps:$4 sm:$0xff]  }
 0x2de   :  { %945 = vmatprep.subr.bf16.mxu0 %v4345_v42  ;;  %v4364_v42 = vld [vmem:[#allocation2 + $0xf0] ss:$8 sps:$4 sm:$0xff]  }
 0x2df   :  { %v556_v4 = vadd.f32 %v554_v2, %v552_v3 }
 0x2e0   :  { %v562_v5 = vpop.permute.xlu0 %561  ;;  %v566_v8 = vpop.permute.xlu1 %565 }
 0x2e1   :  { %v560_v6 = vadd.f32 %v558_v1, %v556_v4  ;;  %946 = vmatpush1.bf16.msra.mxu0 %v4343_v45  ;;  %v4369_v45 = vld [vmem:[#allocation2 + $0xe4] ss:$8 sps:$4 sm:$0xff]  }
 0x2e2   :  { %947 = vmatprep.subr.bf16.mxu0 %v4348_v49  ;;  %v4367_v49 = vld [vmem:[#allocation2 + $0xe0] ss:$8 sps:$4 sm:$0xff]  }
 0x2e3   :  { %v564_v9 = vadd.f32 %v562_v5, %v560_v6 }
 0x2e4   :  { %v570_v11 = vpop.permute.xlu0 %569  ;;  %v574_v13 = vpop.permute.xlu1 %573 }
 0x2e5   :  { %v568_v10 = vadd.f32 %v566_v8, %v564_v9  ;;  %948 = vmatpush1.bf16.msra.mxu0 %v4346_v50  ;;  %v4372_v50 = vld [vmem:[#allocation2 + $0xd4] ss:$8 sps:$4 sm:$0xff]  }
 0x2e6   :  { %949 = vmatprep.subr.bf16.mxu0 %v4351_v52  ;;  %v4370_v52 = vld [vmem:[#allocation2 + $0xd0] ss:$8 sps:$4 sm:$0xff]  }
 0x2e7   :  { %v572_v12 = vadd.f32 %v570_v11, %v568_v10 }
 0x2e9   :  { %v576_v14 = vadd.f32 %v574_v13, %v572_v12  ;;  %950 = vmatpush2.bf16.msra.mxu0 %v4349_v53 }
 0x2ea   :  { %951 = vmatprep.subr.bf16.mxu0 %v4354_v54 }
 0x2eb   :  { %v577_v15 = vmul.f32 0.001953125, %v576_v14 }
 0x2ed   :  { %v578_v17 = vmul.f32 %v577_v15, %v577_v15  ;;  %952 = vmatpush2.bf16.msra.mxu0 %v4352_v55 }
 0x2ee   :  { %953 = vmatprep.subr.bf16.mxu0 %v4357_v56 }
 0x2ef   :  { %v580_v19 = vrot.slane %v578_v17, 7 }
 0x2f1   :  { %v582_v20 = vsub.f32 %v577_v15, %v580_v19  ;;  %954 = vmatpush2.bf16.msra.mxu0 %v4355_v58 }
 0x2f2   :  { %955 = vmatprep.subr.bf16.mxu0 %v4360_v36  ;;  %v4420_v36 = vld [vmem:[#allocation2 + $0x2a4] ss:$8 sps:$4 sm:$0xff]  }
 0x2f3   :  { %v583_v21 = vadd.f32 1e-05, %v582_v20 }
 0x2f5   :  { %4603 = vrsqrt.f32 %v583_v21  ;;  %956 = vmatpush2.bf16.msra.mxu0 %v4358_v37  ;;  %v4374_v37 = vld [vmem:[%s5373_s1 + $0x68] sm:$0xff]  }
 0x2f6   :  { %957 = vmatprep.subr.bf16.mxu0 %v4363_v39  ;;  %v4418_v39 = vld [vmem:[#allocation2 + $0x2a0] ss:$8 sps:$4 sm:$0xff]  }
 0x2f9   :  { %958 = vmatpush2.bf16.msra.mxu0 %v4361_v40  ;;  %v4375_v40 = vld [vmem:[%s5373_s1 + $0x70] sm:$0xff]  }
 0x2fa   :  { %959 = vmatprep.subr.bf16.mxu0 %v4366_v41  ;;  %v4423_v41 = vld [vmem:[#allocation2 + $0x204] ss:$8 sps:$4 sm:$0xff]  }
 0x2fd   :  { %960 = vmatpush2.bf16.msra.mxu0 %v4364_v42  ;;  %v4421_v42 = vld [vmem:[#allocation2 + $0x200] ss:$8 sps:$4 sm:$0xff]  }
 0x2fe   :  { %961 = vmatprep.subr.bf16.mxu0 %v4369_v45  ;;  %v4424_v45 = vld [vmem:[#allocation2 + $0x290] ss:$8 sps:$4 sm:$0xff]  }
 0x301   :  { %962 = vmatpush2.bf16.msra.mxu0 %v4367_v49  ;;  %v4426_v49 = vld [vmem:[#allocation2 + $0x294] ss:$8 sps:$4 sm:$0xff]  }
 0x302   :  { %v4604_v22 = vpop.eup %4603  ;;  %963 = vmatprep.subr.bf16.mxu0 %v4372_v50  ;;  %v4429_v50 = vld [vmem:[#allocation2 + $0x1f4] ss:$8 sps:$4 sm:$0xff]  }
 0x303   :  { %v586_v24 = vrot.slane %v4604_v22, 1 }
 0x305   :  { %v588_v25 = vmul.f32 %v586_v24, %v470_v23  ;;  %964 = vmatpush2.bf16.msra.mxu0 %v4370_v52  ;;  %v4427_v52 = vld [vmem:[#allocation2 + $0x1f0] ss:$8 sps:$4 sm:$0xff]  }
 0x307   :  { %v589_v26 = vmul.f32 %v588_v25, %v577_v15 }
 0x309   :  { %v591_v27 = vrot.slane %v589_v26, 7 }
 0x30b   :  { %v593_v28 = vsub.f32 %v470_v23, %v591_v27 }
 0x30d   :  { %v594_v29 = vsel %vm515_vm5, %v588_v25, %v593_v28 }
 0x30e   :  { %599 = vrot.lane.b32.xlu1 %v594_v29, %s4679_s25  ;;  %596 = vrot.lane.b32.xlu0 %v594_v29, %s4678_s24 }
 0x312   :  { %605 = vrot.lane.b32.xlu1 %v594_v29, %s4682_s27  ;;  %602 = vrot.lane.b32.xlu0 %v594_v29, %s4681_s26 }
 0x316   :  { %611 = vrot.lane.b32.xlu1 %v594_v29, %s4683_s2  ;;  %608 = vrot.lane.b32.xlu0 %v594_v29, %s4685_s5 }
 0x31a   :  { %614 = vrot.lane.b32.xlu0 %v594_v29, %s4684_s30 }
 0x380   :  { %v600_v59 = vpop.permute.xlu1 %599  ;;  %v597_v60 = vpop.permute.xlu0 %596 }
 0x381   :  { %v617_v61 = vsel %vm317_vm1, %v594_v29, %v597_v60 }
 0x382   :  { %v618_v63 = vsel %vm109_vm0, %v617_v61, %v600_v59 }
 0x384   :  { %v606_v62 = vpop.permute.xlu1 %605  ;;  %v603_v1 = vpop.permute.xlu0 %602 }
 0x385   :  { %v619_v2 = vsel %vm326_vm2, %v618_v63, %v603_v1 }
 0x386   :  { %v620_v3 = vsel %vm331_vm3, %v619_v2, %v606_v62 }
 0x388   :  { %v609_v4 = vpop.permute.xlu0 %608  ;;  %v612_v5 = vpop.permute.xlu1 %611 }
 0x389   :  { %v621_v6 = vsel %vm410_vm4, %v620_v3, %v609_v4 }
 0x38a   :  { %v623_v8 = vsel %vm622_vm6, %v621_v6, %v612_v5  ;;  %v4686_v5 = vmov 0.0   ;;  %v4376_v6 = vld [vmem:[#allocation2 + $0x1c0] ss:$8 sps:$4 sm:$0xff]  }
 0x38b   :  { %4113 = vmatprep.subr.bf16.mxu0 %v4686_v5 }
 0x38c   :  { %v615_v9 = vpop.permute.xlu0 %614 }
 0x38d   :  { %v625_v10 = vsel %vm624_vm7, %v623_v8, %v615_v9  ;;  %v4378_v8 = vld [vmem:[#allocation2 + $0x1c4] ss:$8 sps:$4 sm:$0xff]   ;;  %v4381_v9 = vld [vmem:[#allocation2 + $0x1b4] ss:$8 sps:$4 sm:$0xff]  }
 0x38e   :  { %v629_v11 = vrot.slane %v625_v10, %v4814_v35  ;;  %v641_v12 = vrot.slane %v625_v10, %v4819_v38  ;;  %v4379_v10 = vld [vmem:[#allocation2 + $0x1b0] ss:$8 sps:$4 sm:$0xff]  }
 0x390   :  { %v635_v13 = vmul.f32 %v629_v11, %v4843_v57  ;;  %v637_v14 = vmul.f32 %v629_v11, %v4858_v7  ;;  %v634_v15 = vmul.f32 %v629_v11, %v4833_v51  ;;  %v636_v17 = vmul.f32 %v629_v11, %v4852_v0 }
 0x391   :  { %v631_v19 = vmul.f32 %v629_v11, %v4829_v47  ;;  %v633_v20 = vmul.f32 %v629_v11, %v4827_v46  ;;  %v630_v21 = vmul.f32 %v629_v11, %v4825_v44  ;;  %v632_v22 = vmul.f32 %v629_v11, %v4823_v43  ;;  %v4384_v11 = vld [vmem:[#allocation2 + $0x1a4] ss:$8 sps:$4 sm:$0xff]  }
 0x392   :  { %v647_v23 = vadd.f32 %v641_v12, %v635_v13  ;;  %v649_v24 = vadd.f32 %v641_v12, %v637_v14  ;;  %v646_v25 = vadd.f32 %v641_v12, %v634_v15  ;;  %v648_v26 = vadd.f32 %v641_v12, %v636_v17  ;;  %v4387_v13 = vld [vmem:[#allocation2 + $0x194] ss:$8 sps:$4 sm:$0xff]   ;;  %v4385_v14 = vld [vmem:[#allocation2 + $0x190] ss:$8 sps:$4 sm:$0xff]   ;;  %v4390_v15 = vld [vmem:[#allocation2 + $0x184] ss:$8 sps:$4 sm:$0xff]  }
 0x393   :  { %v643_v27 = vadd.f32 %v641_v12, %v631_v19  ;;  %v645_v57 = vadd.f32 %v641_v12, %v633_v20  ;;  %v642_v28 = vadd.f32 %v641_v12, %v630_v21  ;;  %v644_v7 = vadd.f32 %v641_v12, %v632_v22  ;;  %v4382_v12 = vld [vmem:[#allocation2 + $0x1a0] ss:$8 sps:$4 sm:$0xff]   ;;  %v4393_v19 = vld [vmem:[#allocation2 + $0x174] ss:$8 sps:$4 sm:$0xff]   ;;  %v4391_v20 = vld [vmem:[#allocation2 + $0x170] ss:$8 sps:$4 sm:$0xff]  }
 0x394   :  { %v655_v29 = vmax.f32 %v647_v23, 0.0  ;;  %v657_v51 = vmax.f32 %v649_v24, 0.0  ;;  %v654_v30 = vmax.f32 %v646_v25, 0.0  ;;  %v656_v0 = vmax.f32 %v648_v26, 0.0  ;;  %v4388_v17 = vld [vmem:[#allocation2 + $0x180] ss:$8 sps:$4 sm:$0xff]  }
 0x395   :  { %v651_v18 = vmax.f32 %v643_v27, 0.0  ;;  %v653_v47 = vmax.f32 %v645_v57, 0.0  ;;  %v650_v16 = vmax.f32 %v642_v28, 0.0  ;;  %v652_v44 = vmax.f32 %v644_v7, 0.0  ;;  %v4396_v21 = vld [vmem:[#allocation2 + $0x164] ss:$8 sps:$4 sm:$0xff]  }
 0x396   :  { %v697_v31 = vpack.c.bf16 %v657_v51, %v655_v29  ;;  %v696_v46 = vpack.c.bf16 %v656_v0, %v654_v30  ;;  %v4394_v22 = vld [vmem:[#allocation2 + $0x160] ss:$8 sps:$4 sm:$0xff]   ;;  %v4399_v23 = vld [vmem:[#allocation2 + $0x154] ss:$8 sps:$4 sm:$0xff]   ;;  %v4397_v24 = vld [vmem:[#allocation2 + $0x150] ss:$8 sps:$4 sm:$0xff]  }
 0x397   :  { %v695_v43 = vpack.c.bf16 %v653_v47, %v651_v18  ;;  %v694_v32 = vpack.c.bf16 %v652_v44, %v650_v16  ;;  %v4402_v25 = vld [vmem:[#allocation2 + $0x244] ss:$8 sps:$4 sm:$0xff]   ;;  %v4400_v26 = vld [vmem:[#allocation2 + $0x240] ss:$8 sps:$4 sm:$0xff]   ;;  %v4405_v27 = vld [vmem:[#allocation2 + $0x234] ss:$8 sps:$4 sm:$0xff]  }
 0x398   :  { %726 = vmatprep.subr.bf16.mxu1 %v697_v31  ;;  %v4403_v57 = vld [vmem:[#allocation2 + $0x230] ss:$8 sps:$4 sm:$0xff]   ;;  %v4411_v28 = vld [vmem:[#allocation2 + $0x224] ss:$8 sps:$4 sm:$0xff]   ;;  %v4409_v7 = vld [vmem:[#allocation2 + $0x220] ss:$8 sps:$4 sm:$0xff]  }
 0x399   :  { %727 = vmatpush1.bf16.msra.mxu1 %v696_v46  ;;  %v4417_v29 = vld [vmem:[#allocation2 + $0x214] ss:$8 sps:$4 sm:$0xff]   ;;  %v4415_v51 = vld [vmem:[#allocation2 + $0x210] ss:$8 sps:$4 sm:$0xff]   ;;  %v4408_v16 = vld [vmem:[#allocation2 + $0x2c4] ss:$8 sps:$4 sm:$0xff]  }
 0x39a   :  { %728 = vmatprep.subr.bf16.mxu1 %v695_v43  ;;  %v4373_v43 = vld [vmem:[%s5373_s1 + $0x60] sm:$0xff]  }
 0x39d   :  { %729 = vmatpush1.bf16.msra.mxu1 %v694_v32  ;;  %v4406_v32 = vld [vmem:[#allocation2 + $0x2c0] ss:$8 sps:$4 sm:$0xff]  }
 0x39e   :  { %1370 = vmatprep.subr.bf16.mxu1 %v4378_v8 }
 0x3a0   :  { %3670 = vmatmul.mubr.msk.bf16.vlgmr.msra.gmra.mxu1 %vm109_vm0, %v4323_v33  ;;  %v4414_v33 = vld [vmem:[#allocation2 + $0x2b4] ss:$8 sps:$4 sm:$0xff]  }
 0x3a1   :  { %756 = vmatprep.mubr.bf16.mxu1 %v4680_v48  ;;  %1371 = vmatpush1.bf16.msra.mxu1 %v4376_v6 }
 0x3a2   :  { %1372 = vmatprep.subr.bf16.mxu1 %v4381_v9 }
 0x3a5   :  { %1373 = vmatpush1.bf16.msra.mxu1 %v4379_v10 }
 0x3a6   :  { %1374 = vmatprep.subr.bf16.mxu1 %v4384_v11 }
 0x3a8   :  { %3671 = vmatmul.mubr.msk.bf16.gmra.mxu1 %vm109_vm0, %v4324_v34  ;;  %v4412_v34 = vld [vmem:[#allocation2 + $0x2b0] ss:$8 sps:$4 sm:$0xff]  }
 0x3a9   :  { %1375 = vmatpush1.bf16.msra.mxu1 %v4382_v12 }
 0x3aa   :  { %1376 = vmatprep.subr.bf16.mxu1 %v4387_v13 }
 0x3ad   :  { %1377 = vmatpush1.bf16.msra.mxu1 %v4385_v14 }
 0x3ae   :  { %1378 = vmatprep.subr.bf16.mxu1 %v4390_v15 }
 0x3b1   :  { %1379 = vmatpush1.bf16.msra.mxu1 %v4388_v17 }
 0x3b2   :  { %1380 = vmatprep.subr.bf16.mxu1 %v4393_v19 }
 0x3b5   :  { %1381 = vmatpush1.bf16.msra.mxu1 %v4391_v20 }
 0x3b6   :  { %1382 = vmatprep.subr.bf16.mxu1 %v4396_v21 }
 0x3b9   :  { %1383 = vmatpush1.bf16.msra.mxu1 %v4394_v22 }
 0x3ba   :  { %1384 = vmatprep.subr.bf16.mxu1 %v4399_v23  ;;  %v3710_v23 = vld [vmem:[%s5375_s3 + $0x20] ss:$8 sm:$0x3] }
 0x3bd   :  { %1385 = vmatpush1.bf16.msra.mxu1 %v4397_v24 }
 0x3be   :  { %1386 = vmatprep.subr.bf16.mxu1 %v4402_v25  ;;  %v1123_v25 = vrot.slane %v3710_v23, %v4814_v35 }
 0x3c1   :  { %1387 = vmatpush2.bf16.msra.mxu1 %v4400_v26  ;;  %v1127_v26 = vrot.slane %v3710_v23, %v4819_v38 }
 0x3c2   :  { %1388 = vmatprep.subr.bf16.mxu1 %v4405_v27 }
 0x3c5   :  { %1389 = vmatpush2.bf16.msra.mxu1 %v4403_v57 }
 0x3c6   :  { %1390 = vmatprep.subr.bf16.mxu1 %v4411_v28 }
 0x3c9   :  { %1391 = vmatpush2.bf16.msra.mxu1 %v4409_v7 }
 0x3ca   :  { %1392 = vmatprep.subr.bf16.mxu1 %v4417_v29 }
 0x3cd   :  { %1393 = vmatpush2.bf16.msra.mxu1 %v4415_v51 }
 0x3ce   :  { %1394 = vmatprep.subr.bf16.mxu1 %v4423_v41 }
 0x3d1   :  { %1395 = vmatpush2.bf16.msra.mxu1 %v4421_v42 }
 0x3d2   :  { %1396 = vmatprep.subr.bf16.mxu1 %v4429_v50 }
 0x3d5   :  { %1397 = vmatpush2.bf16.msra.mxu1 %v4427_v52 }
 0x460   :  { %v748_v53 = vpop.f32.mrf.mxu1 }
 0x462   :  { %v750_v54 = vpop.f32.mrf.mxu1 }
 0x464   :  { %v752_v55 = vpop.f32.mrf.mxu1 }
 0x466   :  { %v754_v56 = vpop.f32.mrf.mxu1 }
 0x468   :  { %v758_v58 = vpop.f32.mrf.mxu1 }
 0x469   :  { %v767_v2 = vmax.f32 %v748_v53, %v758_v58  ;;  %v4430_v53 = vld [vmem:[#allocation2 + $0x280] ss:$8 sps:$4 sm:$0xff]   ;;  %v4436_v58 = vld [vmem:[#allocation2 + $0x270] ss:$8 sps:$4 sm:$0xff]  }
 0x46a   :  { %v760_v59 = vpop.f32.mrf.mxu1 }
 0x46b   :  { %v768_v63 = vmax.f32 %v750_v54, %v760_v59  ;;  %v4432_v54 = vld [vmem:[#allocation2 + $0x284] ss:$8 sps:$4 sm:$0xff]   ;;  %v4438_v59 = vld [vmem:[#allocation2 + $0x274] ss:$8 sps:$4 sm:$0xff]  }
 0x46c   :  { %v762_v60 = vpop.f32.mrf.mxu1 }
 0x46d   :  { %v769_v61 = vmax.f32 %v752_v55, %v762_v60  ;;  %v4435_v55 = vld [vmem:[#allocation2 + $0x1e4] ss:$8 sps:$4 sm:$0xff]   ;;  %v4441_v60 = vld [vmem:[#allocation2 + $0x1d4] ss:$8 sps:$4 sm:$0xff]  }
 0x46e   :  { %v764_v62 = vpop.f32.mrf.mxu1  ;;  %1398 = vmatprep.subr.bf16.mxu1 %v4435_v55 }
 0x46f   :  { %v770_v1 = vmax.f32 %v754_v56, %v764_v62  ;;  %v771_v4 = vpack.c.bf16 %v769_v61, %v767_v2  ;;  %v4433_v56 = vld [vmem:[#allocation2 + $0x1e0] ss:$8 sps:$4 sm:$0xff]   ;;  %v4439_v61 = vld [vmem:[#allocation2 + $0x1d0] ss:$8 sps:$4 sm:$0xff]   ;;  %v4444_v62 = vld [vmem:[#allocation2 + $0x264] ss:$8 sps:$4 sm:$0xff]  }
 0x470   :  { %1399 = vmatpush2.bf16.msra.mxu1 %v4433_v56  ;;  %v4447_v2 = vld [vmem:[#allocation2 + $0x254] ss:$8 sps:$4 sm:$0xff]  }
 0x471   :  { %v772_v3 = vpack.c.bf16 %v770_v1, %v768_v63  ;;  %1400 = vmatprep.subr.bf16.mxu1 %v4441_v60  ;;  %v4442_v63 = vld [vmem:[#allocation2 + $0x260] ss:$8 sps:$4 sm:$0xff]   ;;  %v4445_v1 = vld [vmem:[#allocation2 + $0x250] ss:$8 sps:$4 sm:$0xff]  }
 0x473   :  { %965 = vmatprep.mubr.bf16.mxu0 %v772_v3 }
 0x474   :  { %966 = vmatmul.mubr.bf16.vlgmr.msra.gmra.mxu0 %v771_v4  ;;  %1401 = vmatpush2.bf16.msra.mxu1 %v4439_v61 }
 0x475   :  { %4115 = vmatprep.mubr.msk.bf16.mxu0 %vm4687_vm8, %v4686_v5 }
 0x534   :  { %v967_v30 = vpop.f32.mrf.mxu0 }
 0x536   :  { %v969_v0 = vpop.f32.mrf.mxu0 }
 0x537   :  { %v976_v31 = vmax.f32 %v967_v30, %v969_v0 }
 0x538   :  { %v971_v18 = vpop.f32.mrf.mxu0 }
 0x53a   :  { %v973_v47 = vpop.f32.mrf.mxu0 }
 0x53b   :  { %v977_v46 = vmax.f32 %v971_v18, %v973_v47 }
 0x53d   :  { %v978_v44 = vpack.c.bf16 %v977_v46, %v976_v31 }
 0x53f   :  { %4114 = vmatpush3.bf16.msra.mxu0 %v978_v44 }
 0x540   :  { %1413 = vmatprep.subr.bf16.mxu0 %v4408_v16 }
 0x542   :  { %4116 = vmatmul.mubr.msk.bf16.vlgmr.msra.gmra.mxu0 %vm317_vm1, %v4373_v43 }
 0x543   :  { %4119 = vmatprep.mubr.msk.bf16.mxu0 %vm4687_vm8, %v4686_v5  ;;  %1414 = vmatpush1.bf16.msra.mxu0 %v4406_v32 }
 0x544   :  { %1415 = vmatprep.subr.bf16.mxu0 %v4414_v33 }
 0x547   :  { %1416 = vmatpush1.bf16.msra.mxu0 %v4412_v34 }
 0x548   :  { %1417 = vmatprep.subr.bf16.mxu0 %v4420_v36 }
 0x54a   :  { %4120 = vmatmul.mubr.msk.bf16.gmra.mxu0 %vm317_vm1, %v4374_v37 }
 0x54b   :  { %4123 = vmatprep.mubr.msk.bf16.mxu0 %vm4687_vm8, %v4686_v5  ;;  %1418 = vmatpush1.bf16.msra.mxu0 %v4418_v39 }
 0x54c   :  { %1419 = vmatprep.subr.bf16.mxu0 %v4426_v49 }
 0x54f   :  { %1420 = vmatpush1.bf16.msra.mxu0 %v4424_v45 }
 0x550   :  { %1421 = vmatprep.subr.bf16.mxu0 %v4432_v54 }
 0x552   :  { %4124 = vmatmul.mubr.msk.bf16.gmra.mxu0 %vm317_vm1, %v4375_v40 }
 0x553   :  { %1445 = vmatprep.mubr.bf16.mxu0 %v4680_v48  ;;  %1422 = vmatpush1.bf16.msra.mxu0 %v4430_v53 }
 0x554   :  { %1423 = vmatprep.subr.bf16.mxu0 %v4438_v59 }
 0x557   :  { %1424 = vmatpush1.bf16.msra.mxu0 %v4436_v58 }
 0x558   :  { %1425 = vmatprep.subr.bf16.mxu0 %v4444_v62 }
 0x55b   :  { %1426 = vmatpush1.bf16.msra.mxu0 %v4442_v63 }
 0x55c   :  { %1427 = vmatprep.subr.bf16.mxu0 %v4447_v2 }
 0x55f   :  { %1428 = vmatpush1.bf16.msra.mxu0 %v4445_v1 }
 0x602   :  { %v1043_v3 = vpop.f32.mrf.mxu0 }
 0x604   :  { %v4117_v4 = vpop.f32.mrf.mxu0 }
 0x606   :  { %v1046_v6 = vpop.f32.mrf.mxu0 }
 0x607   :  { %v1066_v13 = vpack.c.bf16 %v1046_v6, %v1043_v3 }
 0x608   :  { %v4118_v8 = vpop.f32.mrf.mxu0 }
 0x60a   :  { %v1051_v9 = vpop.f32.mrf.mxu0 }
 0x60c   :  { %v4121_v10 = vpop.f32.mrf.mxu0 }
 0x60e   :  { %v1054_v11 = vpop.f32.mrf.mxu0 }
 0x60f   :  { %v1067_v12 = vpack.c.bf16 %v1054_v11, %v1051_v9 }
 0x610   :  { %v4122_v14 = vpop.f32.mrf.mxu0 }
 0x611   :  { %1402 = vmatprep.mubr.bf16.mxu1 %v1067_v12 }
 0x612   :  { %v1059_v15 = vpop.f32.mrf.mxu0  ;;  %1403 = vmatmul.mubr.bf16.vlgmr.msra.gmra.mxu1 %v1066_v13 }
 0x613   :  { %1645 = vmatprep.mubr.bf16.mxu1 %v4680_v48 }
 0x614   :  { %v4125_v17 = vpop.f32.mrf.mxu0 }
 0x616   :  { %v1062_v19 = vpop.f32.mrf.mxu0 }
 0x617   :  { %v1068_v20 = vpack.c.bf16 %v1062_v19, %v1059_v15 }
 0x618   :  { %v4126_v21 = vpop.f32.mrf.mxu0 }
 0x619   :  { %1446 = vmatmul.mubr.bf16.vlgmr.msra.gmra.mxu0 %v1068_v20 }
 0x6d2   :  { %v1404_v22 = vpop.f32.mrf.mxu1 }
 0x6d3   :  { %v1405_v28 = vadd.f32 %v1404_v22, %v1123_v25 }
 0x6d4   :  { %v1406_v24 = vpop.f32.mrf.mxu1 }
 0x6d5   :  { %v1407_v7 = vadd.f32 %v1406_v24, %v1127_v26 }
 0x6d6   :  { %v1408_v27 = vpop.f32.mrf.mxu1 }
 0x6d7   :  { %v1409_v51 = vadd.f32 %v1408_v27, %v1123_v25 }
 0x6d8   :  { %v1410_v48 = vpop.f32.mrf.mxu1 }
 0x6d9   :  { %v1447_v57 = vpop.f32.mrf.mxu0  ;;  %v1411_v47 = vadd.f32 %v1410_v48, %v1127_v26 }
 0x6da   :  { %v4942_v30 = vadd.f32 %v1447_v57, %v1405_v28 }
 0x6db   :  { %v1449_v29 = vpop.f32.mrf.mxu0 }
 0x6dc   :  { %v4944_v0 = vadd.f32 %v1449_v29, %v1407_v7  ;;  %v1471_v16 = vmul.f32 %v4942_v30, %v4942_v30 }
 0x6dd   :  { %v1451_v18 = vpop.f32.mrf.mxu0 }
 0x6de   :  { %v4946_v31 = vadd.f32 %v1451_v18, %v1409_v51  ;;  %v1472_v33 = vmul.f32 %v4944_v0, %v4944_v0  ;;  %v1456_v51 = vld [vmem:[%s5375_s3 + $0x30] sm:$0x3] }
 0x6df   :  { %v1453_v46 = vpop.f32.mrf.mxu0 }
 0x6e0   :  { %v1457_v44 = vadd.f32 %v4946_v31, %v4942_v30  ;;  %v1473_v43 = vmul.f32 %v4946_v31, %v4946_v31  ;;  %v4954_v32 = vadd.f32 %v1453_v46, %v1411_v47 }
 0x6e2   :  { %v1458_v34 = vrot.slane %v1457_v44, 4  ;;  %v1475_v36 = vadd.f32 %v1473_v43, %v1471_v16  ;;  %v1464_v37 = vadd.f32 %v4954_v32, %v4944_v0  ;;  %v1474_v39 = vmul.f32 %v4954_v32, %v4954_v32 }
 0x6e4   :  { %v1459_v40 = vadd.f32 %v1458_v34, %v1457_v44  ;;  %v1476_v41 = vrot.slane %v1475_v36, 4  ;;  %v1465_v42 = vrot.slane %v1464_v37, 4  ;;  %v1482_v45 = vadd.f32 %v1474_v39, %v1472_v33  ;;  %v4449_v33 = vld [vmem:[#allocation2 + $0x340] ss:$8 sps:$4 sm:$0xff]   ;;  %v4451_v34 = vld [vmem:[#allocation2 + $0x344] ss:$8 sps:$4 sm:$0xff]  }
 0x6e5   :  { %1820 = vmatprep.subr.bf16.mxu0 %v4451_v34  ;;  %v4457_v39 = vld [vmem:[#allocation2 + $0x324] ss:$8 sps:$4 sm:$0xff]  }
 0x6e6   :  { %v1460_v49 = vrot.slane %v1459_v40, 2  ;;  %v1477_v50 = vadd.f32 %v1476_v41, %v1475_v36  ;;  %v1466_v52 = vadd.f32 %v1465_v42, %v1464_v37  ;;  %v1483_v53 = vrot.slane %v1482_v45, 4  ;;  %v4454_v36 = vld [vmem:[#allocation2 + $0x334] ss:$8 sps:$4 sm:$0xff]   ;;  %1821 = vmatpush1.bf16.msra.mxu0 %v4449_v33  ;;  %v4452_v37 = vld [vmem:[#allocation2 + $0x330] ss:$8 sps:$4 sm:$0xff]  }
 0x6e7   :  { %1822 = vmatprep.subr.bf16.mxu0 %v4454_v36  ;;  %v4460_v41 = vld [vmem:[#allocation2 + $0x314] ss:$8 sps:$4 sm:$0xff]   ;;  %v4458_v42 = vld [vmem:[#allocation2 + $0x310] ss:$8 sps:$4 sm:$0xff]   ;;  %v4497_v36 = vld [vmem:[%s5373_s1 + $0x80] sm:$0xff]  }
 0x6e8   :  { %v1461_v54 = vadd.f32 %v1460_v49, %v1459_v40  ;;  %v1478_v55 = vrot.slane %v1477_v50, 2  ;;  %v1467_v56 = vrot.slane %v1466_v52, 2  ;;  %v1484_v58 = vadd.f32 %v1483_v53, %v1482_v45  ;;  %v4455_v40 = vld [vmem:[#allocation2 + $0x320] ss:$8 sps:$4 sm:$0xff]   ;;  %v4463_v45 = vld [vmem:[#allocation2 + $0x304] ss:$8 sps:$4 sm:$0xff]  }
 0x6e9   :  { %v4461_v49 = vld [vmem:[#allocation2 + $0x300] ss:$8 sps:$4 sm:$0xff]   ;;  %v4469_v53 = vld [vmem:[#allocation2 + $0x2e4] ss:$8 sps:$4 sm:$0xff]  }
 0x6ea   :  { %v1468_v59 = vadd.f32 %v1467_v56, %v1466_v52  ;;  %v1485_v60 = vrot.slane %v1484_v58, 2  ;;  %v1462_v61 = vrot.slane %v1461_v54, 1  ;;  %v1479_v62 = vadd.f32 %v1478_v55, %v1477_v50  ;;  %1823 = vmatpush1.bf16.msra.mxu0 %v4452_v37  ;;  %v4466_v50 = vld [vmem:[#allocation2 + $0x2f4] ss:$8 sps:$4 sm:$0xff]   ;;  %v4464_v52 = vld [vmem:[#allocation2 + $0x2f0] ss:$8 sps:$4 sm:$0xff]  }
 0x6eb   :  { %1824 = vmatprep.subr.bf16.mxu0 %v4457_v39  ;;  %v4472_v55 = vld [vmem:[#allocation2 + $0x2d4] ss:$8 sps:$4 sm:$0xff]   ;;  %v4470_v56 = vld [vmem:[#allocation2 + $0x2d0] ss:$8 sps:$4 sm:$0xff]  }
 0x6ec   :  { %v1480_v63 = vrot.slane %v1479_v62, 1  ;;  %v1486_v1 = vadd.f32 %v1485_v60, %v1484_v58  ;;  %v1463_v2 = vadd.f32 %v1462_v61, %v1461_v54  ;;  %v1469_v4 = vrot.slane %v1468_v59, 1  ;;  %v4467_v54 = vld [vmem:[#allocation2 + $0x2e0] ss:$8 sps:$4 sm:$0xff]   ;;  %v4475_v58 = vld [vmem:[#allocation2 + $0x3c4] ss:$8 sps:$4 sm:$0xff]  }
 0x6ed   :  { %v4478_v60 = vld [vmem:[#allocation2 + $0x3b4] ss:$8 sps:$4 sm:$0xff]   ;;  %v4476_v61 = vld [vmem:[#allocation2 + $0x3b0] ss:$8 sps:$4 sm:$0xff]  }
 0x6ee   :  { %v1481_v3 = vadd.f32 %v1480_v63, %v1479_v62  ;;  %v1487_v6 = vrot.slane %v1486_v1, 1  ;;  %v1470_v10 = vadd.f32 %v1469_v4, %v1468_v59  ;;  %1825 = vmatpush1.bf16.msra.mxu0 %v4455_v40  ;;  %v4473_v59 = vld [vmem:[#allocation2 + $0x3c0] ss:$8 sps:$4 sm:$0xff]   ;;  %v4481_v62 = vld [vmem:[#allocation2 + $0x3a4] ss:$8 sps:$4 sm:$0xff]  }
 0x6ef   :  { %1826 = vmatprep.subr.bf16.mxu0 %v4460_v41  ;;  %v4479_v63 = vld [vmem:[#allocation2 + $0x3a0] ss:$8 sps:$4 sm:$0xff]  }
 0x6f0   :  { %v1489_v8 = vsel %vm515_vm5, %v1463_v2, %v1481_v3  ;;  %v1488_v9 = vadd.f32 %v1487_v6, %v1486_v1  ;;  %v4484_v1 = vld [vmem:[#allocation2 + $0x394] ss:$8 sps:$4 sm:$0xff]   ;;  %v4482_v2 = vld [vmem:[#allocation2 + $0x390] ss:$8 sps:$4 sm:$0xff]   ;;  %v4487_v3 = vld [vmem:[#allocation2 + $0x384] ss:$8 sps:$4 sm:$0xff]  }
 0x6f1   :  { %1496 = vrot.lane.b32.xlu0 %v1489_v8, %s4682_s27  ;;  %1492 = vrot.lane.b32.xlu1 %v1489_v8, %s4683_s2  ;;  %v4485_v4 = vld [vmem:[#allocation2 + $0x380] ss:$8 sps:$4 sm:$0xff]  }
 0x6f2   :  { %v1490_v11 = vsel %vm515_vm5, %v1470_v10, %v1488_v9  ;;  %1827 = vmatpush1.bf16.msra.mxu0 %v4458_v42 }
 0x6f3   :  { %1828 = vmatprep.subr.bf16.mxu0 %v4463_v45  ;;  %v4499_v45 = vld [vmem:[%s5373_s1 + $0x108] sm:$0xff]  }
 0x6f5   :  { %1506 = vrot.lane.b32.xlu0 %v1490_v11, %s4683_s2  ;;  %1500 = vrot.lane.b32.xlu1 %v1489_v8, %s4679_s25 }
 0x6f6   :  { %1829 = vmatpush1.bf16.msra.mxu0 %v4461_v49 }
 0x6f7   :  { %1830 = vmatprep.subr.bf16.mxu0 %v4466_v50 }
 0x6f9   :  { %1514 = vrot.lane.b32.xlu0 %v1490_v11, %s4679_s25  ;;  %1510 = vrot.lane.b32.xlu1 %v1490_v11, %s4682_s27 }
 0x6fa   :  { %1831 = vmatpush1.bf16.msra.mxu0 %v4464_v52  ;;  %v4498_v52 = vld [vmem:[%s5373_s1 + $0x88] ss:$0 sps:$4 sm:$0xff]  }
 0x6fb   :  { %1832 = vmatprep.subr.bf16.mxu0 %v4469_v53  ;;  %v4500_v53 = vld [vmem:[%s5373_s1 + $0xc8] sm:$0xff]  }
 0x6fe   :  { %1833 = vmatpush1.bf16.msra.mxu0 %v4467_v54  ;;  %v4501_v54 = vld [vmem:[%s5373_s1 + $0x100] sm:$0xff]  }
 0x6ff   :  { %1834 = vmatprep.subr.bf16.mxu0 %v4472_v55  ;;  %v4502_v55 = vld [vmem:[%s5373_s1 + $0xc0] sm:$0xff]  }
 0x702   :  { %1835 = vmatpush1.bf16.msra.mxu0 %v4470_v56  ;;  %v4503_v56 = vld [vmem:[%s5373_s1 + $0xf8] sm:$0xff]  }
 0x703   :  { %1836 = vmatprep.subr.bf16.mxu0 %v4475_v58  ;;  %v4504_v58 = vld [vmem:[%s5373_s1 + $0xb8] sm:$0xff]  }
 0x706   :  { %1837 = vmatpush2.bf16.msra.mxu0 %v4473_v59  ;;  %v4505_v59 = vld [vmem:[%s5373_s1 + $0xf0] sm:$0xff]  }
 0x707   :  { %1838 = vmatprep.subr.bf16.mxu0 %v4478_v60  ;;  %v4506_v60 = vld [vmem:[%s5373_s1 + $0xb0] sm:$0xff]  }
 0x70a   :  { %1839 = vmatpush2.bf16.msra.mxu0 %v4476_v61  ;;  %v4507_v61 = vld [vmem:[%s5373_s1 + $0xe8] sm:$0xff]  }
 0x70b   :  { %1840 = vmatprep.subr.bf16.mxu0 %v4481_v62  ;;  %v4508_v62 = vld [vmem:[%s5373_s1 + $0xa8] sm:$0xff]  }
 0x70e   :  { %1841 = vmatpush2.bf16.msra.mxu0 %v4479_v63  ;;  %v4509_v63 = vld [vmem:[%s5373_s1 + $0xe0] sm:$0xff]  }
 0x70f   :  { %1842 = vmatprep.subr.bf16.mxu0 %v4484_v1  ;;  %v4510_v1 = vld [vmem:[%s5373_s1 + $0xa0] sm:$0xff]  }
 0x712   :  { %1843 = vmatpush2.bf16.msra.mxu0 %v4482_v2  ;;  %v4511_v2 = vld [vmem:[%s5373_s1 + $0xd8] sm:$0xff]  }
 0x713   :  { %1844 = vmatprep.subr.bf16.mxu0 %v4487_v3  ;;  %v4512_v3 = vld [vmem:[%s5373_s1 + $0x98] sm:$0xff]  }
 0x716   :  { %1845 = vmatpush2.bf16.msra.mxu0 %v4485_v4  ;;  %v4513_v4 = vld [vmem:[%s5373_s1 + $0xd0] sm:$0xff]  }
 0x763   :  { %v1497_v12 = vpop.permute.xlu0 %1496  ;;  %v1493_v13 = vpop.permute.xlu1 %1492 }
 0x764   :  { %v1495_v14 = vadd.f32 %v1493_v13, %v1489_v8 }
 0x766   :  { %v1499_v15 = vadd.f32 %v1497_v12, %v1495_v14 }
 0x767   :  { %v1501_v17 = vpop.permute.xlu1 %1500  ;;  %v1507_v20 = vpop.permute.xlu0 %1506 }
 0x768   :  { %v1503_v19 = vadd.f32 %v1501_v17, %v1499_v15 }
 0x76a   :  { %v1504_v21 = vadd.f32 %v1503_v19, %v1490_v11 }
 0x76b   :  { %v1511_v23 = vpop.permute.xlu1 %1510  ;;  %v1515_v25 = vpop.permute.xlu0 %1514 }
 0x76c   :  { %v1509_v22 = vadd.f32 %v1507_v20, %v1504_v21 }
 0x76e   :  { %v1513_v24 = vadd.f32 %v1511_v23, %v1509_v22 }
 0x770   :  { %v1517_v26 = vadd.f32 %v1515_v25, %v1513_v24 }
 0x772   :  { %v1518_v27 = vmul.f32 0.0078125, %v1517_v26 }
 0x774   :  { %v1519_v57 = vmul.f32 %v1518_v27, %v1518_v27 }
 0x776   :  { %v1521_v28 = vrot.slane %v1519_v57, 7 }
 0x778   :  { %v1523_v7 = vsub.f32 %v1518_v27, %v1521_v28 }
 0x77a   :  { %v1524_v48 = vadd.f32 1e-05, %v1523_v7 }
 0x77c   :  { %4605 = vrsqrt.f32 %v1524_v48  ;;  %v4491_v48 = vld [vmem:[#allocation2 + $0x360] ss:$8 sps:$4 sm:$0xff]  }
 0x789   :  { %v4606_v29 = vpop.eup %4605 }
 0x78a   :  { %v1527_v18 = vrot.slane %v4606_v29, 1  ;;  %v4496_v29 = vld [vmem:[#allocation2 + $0x354] ss:$8 sps:$4 sm:$0xff]  }
 0x78c   :  { %v1529_v47 = vmul.f32 %v1527_v18, %v1456_v51 }
 0x78e   :  { %v1530_v46 = vmul.f32 %v1529_v47, %v1518_v27 }
 0x790   :  { %v1532_v16 = vrot.slane %v1530_v46, 7 }
 0x792   :  { %v1534_v44 = vsub.f32 %v1456_v51, %v1532_v16  ;;  %v4494_v51 = vld [vmem:[#allocation2 + $0x350] ss:$8 sps:$4 sm:$0xff]  }
 0x794   :  { %v1535_v43 = vsel %vm515_vm5, %v1529_v47, %v1534_v44 }
 0x795   :  { %1540 = vrot.lane.b32.xlu0 %v1535_v43, %s4682_s27  ;;  %1537 = vrot.lane.b32.xlu1 %v1535_v43, %s4679_s25 }
 0x799   :  { %1543 = vrot.lane.b32.xlu1 %v1535_v43, %s4683_s2 }
 0x807   :  { %v1538_v6 = vpop.permute.xlu1 %1537  ;;  %v1541_v8 = vpop.permute.xlu0 %1540 }
 0x808   :  { %v1546_v9 = vsel %vm109_vm0, %v1535_v43, %v1538_v6  ;;  %v4514_v6 = vld [vmem:[%s5373_s1 + $0x90] sm:$0xff]  }
 0x809   :  { %v1547_v10 = vsel %vm331_vm3, %v1546_v9, %v1541_v8 }
 0x80b   :  { %v1544_v11 = vpop.permute.xlu1 %1543 }
 0x80c   :  { %v1548_v12 = vsel %vm622_vm6, %v1547_v10, %v1544_v11 }
 0x80d   :  { %v1552_v13 = vrot.slane %v1548_v12, %v4814_v35  ;;  %v1560_v14 = vrot.slane %v1548_v12, %v4819_v38 }
 0x80f   :  { %v1553_v15 = vmul.f32 %v1552_v13, %v4942_v30  ;;  %v1555_v17 = vmul.f32 %v1552_v13, %v4946_v31  ;;  %v1554_v19 = vmul.f32 %v1552_v13, %v4944_v0  ;;  %v1556_v20 = vmul.f32 %v1552_v13, %v4954_v32  ;;  %v4448_v30 = vld [vmem:[%s5373_s1 + $0x78] sm:$0xff]   ;;  %v4493_v32 = vld [vmem:[#allocation2 + $0x364] ss:$8 sps:$4 sm:$0xff]  }
 0x810   :  { %v4490_v0 = vld [vmem:[#allocation2 + $0x374] ss:$8 sps:$4 sm:$0xff]   ;;  %v4488_v31 = vld [vmem:[#allocation2 + $0x370] ss:$8 sps:$4 sm:$0xff]   ;;  %v4515_v13 = vld [vmem:[%s5373_s1 + $0x148] sm:$0xff]  }
 0x811   :  { %v1562_v21 = vadd.f32 %v1560_v14, %v1554_v19  ;;  %v1564_v22 = vadd.f32 %v1560_v14, %v1556_v20  ;;  %v1561_v23 = vadd.f32 %v1560_v14, %v1553_v15  ;;  %v1563_v24 = vadd.f32 %v1560_v14, %v1555_v17  ;;  %1846 = vmatprep.subr.bf16.mxu0 %v4490_v0  ;;  %v4516_v15 = vld [vmem:[%s5373_s1 + $0x140] sm:$0xff]   ;;  %v4517_v17 = vld [vmem:[%s5373_s1 + $0x138] sm:$0xff]   ;;  %v4518_v19 = vld [vmem:[%s5373_s1 + $0x130] sm:$0xff]  }
 0x812   :  { %1847 = vmatpush2.bf16.msra.mxu0 %v4488_v31  ;;  %v4519_v20 = vld [vmem:[%s5373_s1 + $0x128] sm:$0xff]  }
 0x813   :  { %v1566_v25 = vmax.f32 %v1562_v21, 0.0  ;;  %v1568_v26 = vmax.f32 %v1564_v22, 0.0  ;;  %v1565_v27 = vmax.f32 %v1561_v23, 0.0  ;;  %v1567_v57 = vmax.f32 %v1563_v24, 0.0  ;;  %1848 = vmatprep.subr.bf16.mxu0 %v4493_v32  ;;  %v4520_v21 = vld [vmem:[%s5373_s1 + $0x120] sm:$0xff]   ;;  %v4521_v22 = vld [vmem:[%s5373_s1 + $0x118] sm:$0xff]  }
 0x814   :  { %v4522_v23 = vld [vmem:[%s5373_s1 + $0x110] sm:$0xff]  }
 0x815   :  { %v1604_v28 = vpack.c.bf16 %v1568_v26, %v1566_v25  ;;  %v1603_v7 = vpack.c.bf16 %v1567_v57, %v1565_v27  ;;  %v4523_v25 = vld [vmem:[%s5373_s1 + $0x150] sm:$0xff]  }
 0x816   :  { %1849 = vmatpush2.bf16.msra.mxu0 %v4491_v48 }
 0x817   :  { %1627 = vmatprep.subr.bf16.mxu1 %v1604_v28  ;;  %1850 = vmatprep.subr.bf16.mxu0 %v4496_v29 }
 0x818   :  { %1628 = vmatpush1.bf16.msra.mxu1 %v1603_v7 }
 0x81a   :  { %1851 = vmatpush2.bf16.msra.mxu0 %v4494_v51 }
 0x81b   :  { %3760 = vmatmul.mubr.msk.bf16.vlgmr.msra.gmra.mxu1 %vm317_vm1, %v4448_v30  ;;  %v1984_v30 = vld [vmem:[%s5375_s3 + $0x40] ss:$0 sm:$0xff] }
 0x81c   :  { %4129 = vmatprep.mubr.msk.bf16.mxu1 %vm1874_vm9, %v4497_v36 }
 0x8db   :  { %v1647_v18 = vpop.f32.mrf.mxu1 }
 0x8dd   :  { %v1649_v47 = vpop.f32.mrf.mxu1 }
 0x8df   :  { %v1651_v46 = vpop.f32.mrf.mxu1 }
 0x8e0   :  { %v1656_v16 = vmax.f32 %v1647_v18, %v1651_v46 }
 0x8e1   :  { %v1653_v44 = vpop.f32.mrf.mxu1 }
 0x8e2   :  { %v1657_v43 = vmax.f32 %v1649_v47, %v1653_v44  ;;  %v1658_v34 = vpack.c.bf16 %v1656_v16, %v1656_v16 }
 0x8e4   :  { %v1659_v33 = vpack.c.bf16 %v1657_v43, %v1657_v43 }
 0x8e6   :  { %1852 = vmatprep.mubr.bf16.mxu0 %v1659_v33  ;;  %v4524_v33 = vld [vmem:[%s5373_s1 + $0x158] ss:$0 sps:$4 sm:$0xff]  }
 0x8e7   :  { %1853 = vmatmul.mubr.bf16.vlgmr.msra.gmra.mxu0 %v1658_v34  ;;  %v4525_v34 = vld [vmem:[#allocation2 + $0x3d0] ss:$8 sps:$4 sm:$0x3f]  }
 0x8e8   :  { %4155 = vmatprep.mubr.msk.bf16.mxu0 %vm1874_vm9, %v4523_v25  ;;  %v2310_v36 = vsel %vm2308_vm11, %v4525_v34, 0 }
 0x9a7   :  { %v1854_v37 = vpop.f32.mrf.mxu0 }
 0x9a9   :  { %v1856_v39 = vpop.f32.mrf.mxu0 }
 0x9aa   :  { %v1861_v40 = vmax.f32 %v1854_v37, %v1856_v39 }
 0x9ab   :  { %v1858_v41 = vpop.f32.mrf.mxu0 }
 0x9ac   :  { %v1862_v42 = vpack.c.bf16 %v1861_v40, %v1861_v40 }
 0x9ad   :  { %v1859_v49 = vpop.f32.mrf.mxu0 }
 0x9ae   :  { %v1883_v50 = vsel %vm1881_vm10, %v1862_v42, 0  ;;  %4241 = vmatprep.subr.msk.bf16.mxu1 %vm1881_vm10, %v1862_v42 }
 0x9af   :  { %4128 = vmatpush3.bf16.msra.mxu1 %v1883_v50 }
 0x9b0   :  { %3941 = vmatprep.subr.bf16.mxu1 %v4499_v45 }
 0x9b2   :  { %4130 = vmatmul.mubr.msk.bf16.vlgmr.msra.gmra.mxu1 %vm1874_vm9, %v4498_v52 }
 0x9b3   :  { %3942 = vmatpush3.bf16.msra.mxu1 %v4500_v53  ;;  %v2298_v53 = vld [vmem:[%s5375_s3 + $0x50] ss:$0 sm:$0xff] }
 0x9b4   :  { %3943 = vmatprep.subr.bf16.mxu1 %v4501_v54 }
 0x9b7   :  { %3944 = vmatpush3.bf16.msra.mxu1 %v4502_v55 }
 0x9b8   :  { %3945 = vmatprep.subr.bf16.mxu1 %v4503_v56 }
 0x9bb   :  { %3946 = vmatpush3.bf16.msra.mxu1 %v4504_v58 }
 0x9bc   :  { %3947 = vmatprep.subr.bf16.mxu1 %v4505_v59 }
 0x9bf   :  { %3948 = vmatpush3.bf16.msra.mxu1 %v4506_v60 }
 0x9c0   :  { %3949 = vmatprep.subr.bf16.mxu1 %v4507_v61 }
 0x9c3   :  { %3950 = vmatpush3.bf16.msra.mxu1 %v4508_v62 }
 0x9c4   :  { %3951 = vmatprep.subr.bf16.mxu1 %v4509_v63 }
 0x9c7   :  { %3952 = vmatpush3.bf16.msra.mxu1 %v4510_v1 }
 0x9c8   :  { %3953 = vmatprep.subr.bf16.mxu1 %v4511_v2 }
 0x9cb   :  { %3954 = vmatpush3.bf16.msra.mxu1 %v4512_v3 }
 0x9cc   :  { %3955 = vmatprep.subr.bf16.mxu1 %v4513_v4 }
 0x9cf   :  { %3956 = vmatpush3.bf16.msra.mxu1 %v4514_v6 }
 0x9d0   :  { %4133 = vmatprep.subr.bf16.mxu1 %v4686_v5 }
 0xa72   :  { %v4131_v8 = vpop.f32.mrf.mxu1 }
 0xa73   :  { %v1935_v24 = vpack.c.bf16 %v4131_v8, %v4131_v8 }
 0xa74   :  { %v1919_v9 = vpop.f32.mrf.mxu1 }
 0xa75   :  { %v1933_v14 = vpack.c.bf16 %v1919_v9, %v1919_v9 }
 0xa76   :  { %v4132_v10 = vpop.f32.mrf.mxu1 }
 0xa78   :  { %v1922_v11 = vpop.f32.mrf.mxu1 }
 0xa79   :  { %v1934_v12 = vpack.c.bf16 %v1922_v11, %v1922_v11 }
 0xa7b   :  { %2161 = vmatprep.mubr.bf16.mxu1 %v1934_v12 }
 0xa7c   :  { %2162 = vmatmul.mubr.bf16.vlgmr.msra.gmra.mxu1 %v1933_v14 }
 0xa7d   :  { %4134 = vmatpush3.bf16.msra.mxu1 %v4515_v13  ;;  %4149 = vmatprep.mubr.msk.bf16.mxu1 %vm4687_vm8, %v4686_v5 }
 0xa7e   :  { %4135 = vmatprep.subr.bf16.mxu1 %v4686_v5 }
 0xa81   :  { %4136 = vmatpush3.bf16.msra.mxu1 %v4516_v15 }
 0xa82   :  { %4137 = vmatprep.subr.bf16.mxu1 %v4686_v5 }
 0xa85   :  { %4138 = vmatpush3.bf16.msra.mxu1 %v4517_v17 }
 0xa86   :  { %4139 = vmatprep.subr.bf16.mxu1 %v4686_v5 }
 0xa89   :  { %4140 = vmatpush3.bf16.msra.mxu1 %v4518_v19 }
 0xa8a   :  { %4141 = vmatprep.subr.bf16.mxu1 %v4686_v5 }
 0xa8d   :  { %4142 = vmatpush3.bf16.msra.mxu1 %v4519_v20 }
 0xa8e   :  { %4143 = vmatprep.subr.bf16.mxu1 %v4686_v5 }
 0xa91   :  { %4144 = vmatpush3.bf16.msra.mxu1 %v4520_v21 }
 0xa92   :  { %4145 = vmatprep.subr.bf16.mxu1 %v4686_v5 }
 0xa95   :  { %4146 = vmatpush3.bf16.msra.mxu1 %v4521_v22 }
 0xa96   :  { %4147 = vmatprep.subr.bf16.mxu1 %v4686_v5 }
 0xa99   :  { %4148 = vmatpush3.bf16.msra.mxu1 %v4522_v23 }
 0xa9a   :  { %4165 = vmatprep.subr.bf16.mxu1 %v4686_v5 }
 0xa9c   :  { %4150 = vmatmul.mubr.bf16.vlgmr.msra.gmra.mxu1 %v1935_v24 }
 0xa9d   :  { %4167 = vmatprep.mubr.msk.bf16.mxu1 %vm4687_vm8, %v4686_v5 }
 0xb3c   :  { %v3957_v26 = vpop.f32.mrf.mxu1 }
 0xb3e   :  { %v3958_v27 = vpop.f32.mrf.mxu1 }
 0xb3f   :  { %v3959_v7 = vadd.f32 %v3958_v27, %v3957_v26  ;;  %v2352_v27 = vld [vmem:[%s5375_s3 + $0x60] sm:$0x3] }
 0xb40   :  { %v3960_v57 = vpop.f32.mrf.mxu1 }
 0xb41   :  { %v2164_v0 = vadd.f32 %v3959_v7, %v1984_v30 }
 0xb42   :  { %v3961_v28 = vpop.f32.mrf.mxu1 }
 0xb5c   :  { %v2203_v31 = vpop.f32.mrf.mxu1 }
 0xb5d   :  { %v2204_v32 = vadd.f32 %v2203_v31, %v2164_v0 }
 0xb5e   :  { %v4151_v48 = vpop.f32.mrf.mxu1 }
 0xb5f   :  { %v3821_v29 = vmul.f32 -1.442695, %v2204_v32  ;;  %v4529_v32 = vld [vmem:[#allocation2 + $0x4d0] ss:$8 sps:$4 sm:$0xff]  }
 0xb60   :  { %v2206_v51 = vpop.f32.mrf.mxu1  ;;  %v4530_v48 = vld [vmem:[#allocation2 + $0x450] ss:$8 sps:$4 sm:$0xff]  }
 0xb61   :  { %4607 = vpow2.f32 %v3821_v29  ;;  %v4531_v29 = vld [vmem:[#allocation2 + $0x4c0] ss:$8 sps:$4 sm:$0xff]  }
 0xb62   :  { %v4152_v18 = vpop.f32.mrf.mxu1  ;;  %v4532_v51 = vld [vmem:[#allocation2 + $0x440] ss:$8 sps:$4 sm:$0xff]  }
 0xb63   :  { %v4533_v18 = vld [vmem:[#allocation2 + $0x4b0] ss:$8 sps:$4 sm:$0xff]  }
 0xb6e   :  { %v4608_v47 = vpop.eup %4607 }
 0xb6f   :  { %v2212_v46 = vadd.f32 1.0, %v4608_v47  ;;  %v4535_v47 = vld [vmem:[#allocation2 + $0x430] ss:$8 sps:$4 sm:$0xff]  }
 0xb71   :  { %4609 = vrcp.f32 %v2212_v46  ;;  %v4536_v46 = vld [vmem:[#allocation2 + $0x4a0] ss:$8 sps:$4 sm:$0xff]  }
 0xb7e   :  { %v4610_v16 = vpop.eup %4609 }
 0xb7f   :  { %v2215_v44 = vpack.c.bf16 %v4610_v16, %v4610_v16  ;;  %v4538_v16 = vld [vmem:[#allocation2 + $0x420] ss:$8 sps:$4 sm:$0xff]  }
 0xb81   :  { %4242 = vmatprep.subr.msk.bf16.mxu0 %vm1881_vm10, %v2215_v44  ;;  %v2234_v43 = vsel %vm1881_vm10, %v2215_v44, 0 }
 0xb82   :  { %4154 = vmatpush3.bf16.msra.mxu0 %v2234_v43 }
 0xb83   :  { %4159 = vmatprep.subr.bf16.mxu0 %v4686_v5 }
 0xb85   :  { %4156 = vmatmul.mubr.msk.bf16.vlgmr.msra.gmra.mxu0 %vm1874_vm9, %v4524_v33 }
 0xb86   :  { %4161 = vmatprep.mubr.msk.bf16.mxu0 %vm4687_vm8, %v4686_v5  ;;  %4160 = vmatpush3.bf16.msra.mxu0 %v2310_v36 }
 0xb87   :  { %3981 = vmatprep.subr.bf16.mxu0 %v4529_v32 }
 0xc45   :  { %v4157_v37 = vpop.f32.mrf.mxu0 }
 0xc46   :  { %2289 = vrot.lane.b32.xlu1 %v4157_v37, %s4677_s19 }
 0xc47   :  { %v2270_v39 = vpop.f32.mrf.mxu0 }
 0xc49   :  { %v4158_v40 = vpop.f32.mrf.mxu0 }
 0xc4b   :  { %v2273_v41 = vpop.f32.mrf.mxu0 }
 0xc4c   :  { %2285 = vrot.lane.b32.xlu0 %v2273_v41, %s4688_s6 }
 0xcb8   :  { %v2290_v45 = vpop.permute.xlu1 %2289 }
 0xcbe   :  { %v2286_v42 = vpop.permute.xlu0 %2285 }
 0xcbf   :  { %v2293_v49 = vsel %vm2292_vm12, %v2270_v39, %v2286_v42 }
 0xcc0   :  { %v2294_v50 = vsel %vm1874_vm9, %v2293_v49, %v2290_v45 }
 0xcc1   :  { %v2295_v52 = vpack.c.bf16 %v2294_v50, %v2294_v50 }
 0xcc3   :  { %4162 = vmatmul.mubr.msk.bf16.vlgmr.msra.gmra.mxu0 %vm2304_vm13, %v2295_v52  ;;  %v4526_v52 = vld [vmem:[%s5373_s1 + $0x160] sm:$0xff]  }
 0xcc4   :  { %3982 = vmatpush3.bf16.msra.mxu0 %v4530_v48 }
 0xcc5   :  { %3983 = vmatprep.subr.bf16.mxu0 %v4531_v29 }
 0xcc8   :  { %3984 = vmatpush3.bf16.msra.mxu0 %v4532_v51 }
 0xcc9   :  { %3985 = vmatprep.subr.bf16.mxu0 %v4533_v18 }
 0xccc   :  { %3986 = vmatpush3.bf16.msra.mxu0 %v4535_v47 }
 0xccd   :  { %3987 = vmatprep.subr.bf16.mxu0 %v4536_v46 }
 0xcd0   :  { %3988 = vmatpush3.bf16.msra.mxu0 %v4538_v16 }
 0xd83   :  { %v2346_v54 = vpop.f32.mrf.mxu0 }
 0xd84   :  { %v5106_v55 = vadd.f32 %v2346_v54, %v2298_v53  ;;  %v4534_v53 = vld [vmem:[#allocation2 + $0x550] ss:$8 sps:$4 sm:$0xff]   ;;  %v4537_v54 = vld [vmem:[#allocation2 + $0x540] ss:$8 sps:$4 sm:$0xff]  }
 0xd85   :  { %v4163_v56 = vpop.f32.mrf.mxu0 }
 0xd86   :  { %v2353_v58 = vrot.slane %v5106_v55, 4  ;;  %v2359_v59 = vmul.f32 %v5106_v55, %v5106_v55  ;;  %v4528_v56 = vld [vmem:[%s5373_s1 + $0x170] sm:$0xff]  }
 0xd87   :  { %v2349_v60 = vpop.f32.mrf.mxu0 }
 0xd88   :  { %v2354_v61 = vadd.f32 %v2353_v58, %v5106_v55  ;;  %v2360_v62 = vrot.slane %v2359_v59, 4  ;;  %v4539_v58 = vld [vmem:[#allocation2 + $0x490] ss:$8 sps:$4 sm:$0xff]  }
 0xd89   :  { %v4164_v63 = vpop.f32.mrf.mxu0  ;;  %v4541_v60 = vld [vmem:[#allocation2 + $0x410] ss:$8 sps:$4 sm:$0xff]   ;;  %3989 = vmatprep.subr.bf16.mxu0 %v4539_v58 }
 0xd8a   :  { %v2355_v1 = vrot.slane %v2354_v61, 2  ;;  %v2361_v2 = vadd.f32 %v2360_v62, %v2359_v59  ;;  %v4540_v59 = vld [vmem:[#allocation2 + $0x530] ss:$8 sps:$4 sm:$0xff]   ;;  %3990 = vmatpush3.bf16.msra.mxu0 %v4541_v60  ;;  %v4543_v62 = vld [vmem:[#allocation2 + $0x520] ss:$8 sps:$4 sm:$0xff]  }
 0xd8b   :  { %v4544_v63 = vld [vmem:[#allocation2 + $0x400] ss:$8 sps:$4 sm:$0xff]  }
 0xd8c   :  { %v2356_v3 = vadd.f32 %v2355_v1, %v2354_v61  ;;  %v2362_v4 = vrot.slane %v2361_v2, 2  ;;  %v4542_v61 = vld [vmem:[#allocation2 + $0x480] ss:$8 sps:$4 sm:$0xff]   ;;  %v4545_v1 = vld [vmem:[#allocation2 + $0x470] ss:$8 sps:$4 sm:$0xff]  }
 0xd8d   :  { %3991 = vmatprep.subr.bf16.mxu0 %v4542_v61 }
 0xd8e   :  { %v2357_v6 = vrot.slane %v2356_v3, 1  ;;  %v2363_v8 = vadd.f32 %v2362_v4, %v2361_v2  ;;  %3992 = vmatpush3.bf16.msra.mxu0 %v4544_v63  ;;  %v4546_v2 = vld [vmem:[#allocation2 + $0x510] ss:$8 sps:$4 sm:$0xff]   ;;  %v4548_v4 = vld [vmem:[#allocation2 + $0x460] ss:$8 sps:$4 sm:$0xff]  }
 0xd8f   :  { %3993 = vmatprep.subr.bf16.mxu0 %v4545_v1 }
 0xd90   :  { %v2364_v9 = vrot.slane %v2363_v8, 1  ;;  %v2358_v10 = vadd.f32 %v2357_v6, %v2356_v3  ;;  %v4547_v3 = vld [vmem:[#allocation2 + $0x3f0] ss:$8 sps:$4 sm:$0xff]   ;;  %v4549_v6 = vld [vmem:[#allocation2 + $0x500] ss:$8 sps:$4 sm:$0xff]  }
 0xd92   :  { %v2365_v11 = vadd.f32 %v2364_v9, %v2363_v8  ;;  %3994 = vmatpush3.bf16.msra.mxu0 %v4547_v3  ;;  %v4550_v8 = vld [vmem:[#allocation2 + $0x3e0] ss:$8 sps:$4 sm:$0xff]   ;;  %v4551_v9 = vld [vmem:[#allocation2 + $0x4f0] ss:$8 sps:$4 sm:$0xff]  }
 0xd93   :  { %3995 = vmatprep.subr.bf16.mxu0 %v4548_v4 }
 0xd94   :  { %v2366_v12 = vsel %vm515_vm5, %v2358_v10, %v2365_v11  ;;  %v4552_v10 = vld [vmem:[#allocation2 + $0x4e0] ss:$8 sps:$4 sm:$0xff]  }
 0xd95   :  { %2372 = vrot.lane.b32.xlu1 %v2366_v12, %s4682_s27  ;;  %2368 = vrot.lane.b32.xlu0 %v2366_v12, %s4683_s2 }
 0xd96   :  { %3996 = vmatpush3.bf16.msra.mxu0 %v4550_v8 }
 0xd99   :  { %2376 = vrot.lane.b32.xlu0 %v2366_v12, %s4679_s25 }
 0xe07   :  { %v2369_v13 = vpop.permute.xlu0 %2368  ;;  %v2373_v15 = vpop.permute.xlu1 %2372 }
 0xe08   :  { %v2371_v14 = vadd.f32 %v2369_v13, %v2366_v12 }
 0xe0a   :  { %v2375_v17 = vadd.f32 %v2373_v15, %v2371_v14 }
 0xe0b   :  { %v2377_v19 = vpop.permute.xlu0 %2376 }
 0xe0c   :  { %v2379_v20 = vadd.f32 %v2377_v19, %v2375_v17 }
 0xe0e   :  { %v2380_v21 = vmul.f32 0.03125, %v2379_v20 }
 0xe10   :  { %v2381_v22 = vmul.f32 %v2380_v21, %v2380_v21 }
 0xe12   :  { %v2383_v23 = vrot.slane %v2381_v22, 7 }
 0xe14   :  { %v2385_v24 = vsub.f32 %v2380_v21, %v2383_v23 }
 0xe16   :  { %v2386_v25 = vadd.f32 1e-05, %v2385_v24 }
 0xe18   :  { %4611 = vrsqrt.f32 %v2386_v25 }
 0xe25   :  { %v4612_v26 = vpop.eup %4611 }
 0xe26   :  { %v2389_v57 = vrot.slane %v4612_v26, 1 }
 0xe28   :  { %v2391_v28 = vmul.f32 %v2389_v57, %v2352_v27 }
 0xe2a   :  { %v2392_v7 = vmul.f32 %v2391_v28, %v2380_v21 }
 0xe2c   :  { %v2394_v30 = vrot.slane %v2392_v7, 7  ;;  %v2564_v7 = vld [vmem:[%s5375_s3 + $0x70] ss:$0 sm:$0xff] }
 0xe2e   :  { %v2396_v0 = vsub.f32 %v2352_v27, %v2394_v30 }
 0xe30   :  { %v2397_v31 = vsel %vm515_vm5, %v2391_v28, %v2396_v0 }
 0xe31   :  { %2402 = vrot.lane.b32.xlu0 %v2397_v31, %s4682_s27  ;;  %2399 = vrot.lane.b32.xlu1 %v2397_v31, %s4679_s25 }
 0xe35   :  { %2405 = vrot.lane.b32.xlu1 %v2397_v31, %s4683_s2 }
 0xea3   :  { %v2400_v44 = vpop.permute.xlu1 %2399  ;;  %v2403_v43 = vpop.permute.xlu0 %2402 }
 0xea4   :  { %v2408_v33 = vsel %vm109_vm0, %v2397_v31, %v2400_v44 }
 0xea5   :  { %v2409_v34 = vsel %vm331_vm3, %v2408_v33, %v2403_v43 }
 0xea7   :  { %v2406_v36 = vpop.permute.xlu1 %2405 }
 0xea8   :  { %v2410_v37 = vsel %vm622_vm6, %v2409_v34, %v2406_v36 }
 0xea9   :  { %v2414_v39 = vrot.slane %v2410_v37, %v4814_v35  ;;  %v2419_v41 = vrot.slane %v2410_v37, %v4819_v38 }
 0xeab   :  { %v2415_v40 = vmul.f32 %v2414_v39, %v5106_v55  ;;  %v4527_v55 = vld [vmem:[%s5373_s1 + $0x168] sm:$0xff]  }
 0xead   :  { %v2420_v42 = vadd.f32 %v2419_v41, %v2415_v40 }
 0xeaf   :  { %v2421_v45 = vmax.f32 %v2420_v42, 0.0 }
 0xeb1   :  { %v2422_v49 = vpack.c.bf16 %v2421_v45, %v2421_v45 }
 0xeb3   :  { %v2454_v50 = vsel %vm1881_vm10, %v2422_v49, 0 }
 0xeb4   :  { %4166 = vmatpush3.bf16.msra.mxu1 %v2454_v50 }
 0xeb5   :  { %4179 = vmatprep.subr.bf16.mxu1 %v4686_v5 }
 0xeb7   :  { %4168 = vmatmul.mubr.msk.bf16.vlgmr.msra.gmra.mxu1 %vm1874_vm9, %v4526_v52 }
 0xeb8   :  { %4171 = vmatprep.mubr.msk.bf16.mxu1 %vm4687_vm8, %v4686_v5  ;;  %4180 = vmatpush3.bf16.msra.mxu1 %v4534_v53 }
 0xeb9   :  { %4181 = vmatprep.subr.bf16.mxu1 %v4686_v5 }
 0xebc   :  { %4182 = vmatpush3.bf16.msra.mxu1 %v4537_v54 }
 0xebd   :  { %4183 = vmatprep.subr.bf16.mxu1 %v4686_v5 }
 0xebf   :  { %4172 = vmatmul.mubr.msk.bf16.gmra.mxu1 %vm1874_vm9, %v4527_v55 }
 0xec0   :  { %4175 = vmatprep.mubr.msk.bf16.mxu1 %vm4687_vm8, %v4686_v5  ;;  %4184 = vmatpush3.bf16.msra.mxu1 %v4540_v59 }
 0xec1   :  { %4185 = vmatprep.subr.bf16.mxu1 %v4686_v5 }
 0xec4   :  { %4186 = vmatpush3.bf16.msra.mxu1 %v4543_v62 }
 0xec5   :  { %4187 = vmatprep.subr.bf16.mxu1 %v4686_v5 }
 0xec7   :  { %4176 = vmatmul.mubr.msk.bf16.gmra.mxu1 %vm1874_vm9, %v4528_v56 }
 0xec8   :  { %4195 = vmatprep.mubr.msk.bf16.mxu1 %vm4687_vm8, %v4686_v5  ;;  %4188 = vmatpush3.bf16.msra.mxu1 %v4546_v2 }
 0xec9   :  { %4189 = vmatprep.subr.bf16.mxu1 %v4686_v5 }
 0xecc   :  { %4190 = vmatpush3.bf16.msra.mxu1 %v4549_v6 }
 0xecd   :  { %4191 = vmatprep.subr.bf16.mxu1 %v4686_v5 }
 0xed0   :  { %4192 = vmatpush3.bf16.msra.mxu1 %v4551_v9 }
 0xed1   :  { %4193 = vmatprep.subr.bf16.mxu1 %v4686_v5 }
 0xed4   :  { %4194 = vmatpush3.bf16.msra.mxu1 %v4552_v10 }
 0xf77   :  { %v2490_v11 = vpop.f32.mrf.mxu1 }
 0xf79   :  { %v4169_v12 = vpop.f32.mrf.mxu1 }
 0xf7b   :  { %v2493_v13 = vpop.f32.mrf.mxu1 }
 0xf7c   :  { %v2513_v21 = vpack.c.bf16 %v2493_v13, %v2490_v11 }
 0xf7d   :  { %v4170_v14 = vpop.f32.mrf.mxu1 }
 0xf7f   :  { %v2498_v15 = vpop.f32.mrf.mxu1 }
 0xf81   :  { %v4173_v17 = vpop.f32.mrf.mxu1 }
 0xf82   :  { %v2791_v17 = vld [vmem:[%s5375_s3 + $0x80] sm:$0x3] }
 0xf83   :  { %v2501_v19 = vpop.f32.mrf.mxu1 }
 0xf84   :  { %v2514_v20 = vpack.c.bf16 %v2501_v19, %v2498_v15 }
 0xf85   :  { %v4174_v22 = vpop.f32.mrf.mxu1 }
 0xf86   :  { %2741 = vmatprep.mubr.bf16.mxu0 %v2514_v20 }
 0xf87   :  { %v2506_v23 = vpop.f32.mrf.mxu1  ;;  %2742 = vmatmul.mubr.bf16.vlgmr.msra.gmra.mxu0 %v2513_v21 }
 0xf89   :  { %v4177_v24 = vpop.f32.mrf.mxu1 }
 0xf8b   :  { %v2509_v25 = vpop.f32.mrf.mxu1 }
 0xf8c   :  { %v2515_v26 = vpack.c.bf16 %v2509_v25, %v2506_v23  ;;  %v4553_v25 = vld [vmem:[%s5373_s1 + $0x178] sm:$0xff]  }
 0xf8d   :  { %v4178_v27 = vpop.f32.mrf.mxu1  ;;  %4201 = vmatprep.mubr.msk.bf16.mxu0 %vm317_vm1, %v4553_v25  ;;  %v4597_v25 = vld [vmem:[%s5373_s1 + $0x288] sm:$0xff]  }
 0xf8e   :  { %4196 = vmatmul.mubr.bf16.vlgmr.msra.gmra.mxu1 %v2515_v26  ;;  %v4563_v26 = vld [vmem:[%s5373_s1 + $0x240] sm:$0xff]  }
 0xf8f   :  { %v4564_v27 = vld [vmem:[%s5373_s1 + $0x200] sm:$0xff]   ;;  %4023 = vmatprep.subr.bf16.mxu1 %v4563_v26  ;;  %v4598_v26 = vld [vmem:[%s5373_s1 + $0x248] sm:$0xff]  }
 0xf90   :  { %4024 = vmatpush3.bf16.msra.mxu1 %v4564_v27 }
0x1047   :  { %v3997_v5 = vpop.f32.mrf.mxu0 }
0x1049   :  { %v3998_v57 = vpop.f32.mrf.mxu0 }
0x104a   :  { %v3999_v28 = vadd.f32 %v3998_v57, %v3997_v5  ;;  %v4565_v5 = vld [vmem:[%s5373_s1 + $0x238] sm:$0xff]  }
0x104b   :  { %v4000_v30 = vpop.f32.mrf.mxu0  ;;  %v4566_v57 = vld [vmem:[%s5373_s1 + $0x1f8] sm:$0xff]   ;;  %4025 = vmatprep.subr.bf16.mxu1 %v4565_v5 }
0x104c   :  { %v2744_v31 = vadd.f32 %v3999_v28, %v2564_v7  ;;  %v4567_v28 = vld [vmem:[%s5373_s1 + $0x230] sm:$0xff]   ;;  %4026 = vmatpush3.bf16.msra.mxu1 %v4566_v57 }
0x104d   :  { %v4001_v0 = vpop.f32.mrf.mxu0  ;;  %4027 = vmatprep.subr.bf16.mxu1 %v4567_v28 }
0x104e   :  { %v4002_v32 = vadd.f32 %v4001_v0, %v4000_v30  ;;  %v2784_v48 = vpop.f32.mrf.mxu1  ;;  %v4569_v30 = vld [vmem:[%s5373_s1 + $0x228] sm:$0xff]  }
0x104f   :  { %v5159_v18 = vadd.f32 %v2784_v48, %v2744_v31  ;;  %v4570_v0 = vld [vmem:[%s5373_s1 + $0x1e8] sm:$0xff]  }
0x1050   :  { %v4197_v29 = vpop.f32.mrf.mxu1  ;;  %v2747_v51 = vadd.f32 %v4002_v32, %v2564_v7  ;;  %v4568_v7 = vld [vmem:[%s5373_s1 + $0x1f0] sm:$0xff]  }
0x1051   :  { %v2799_v44 = vmul.f32 %v5159_v18, %v5159_v18  ;;  %4028 = vmatpush3.bf16.msra.mxu1 %v4568_v7 }
0x1052   :  { %v2787_v47 = vpop.f32.mrf.mxu1  ;;  %4029 = vmatprep.subr.bf16.mxu1 %v4569_v30 }
0x1053   :  { %v5161_v46 = vadd.f32 %v2787_v47, %v2747_v51 }
0x1054   :  { %v4198_v16 = vpop.f32.mrf.mxu1 }
0x1055   :  { %v2792_v43 = vadd.f32 %v5161_v46, %v5159_v18  ;;  %v2800_v33 = vmul.f32 %v5161_v46, %v5161_v46  ;;  %4030 = vmatpush3.bf16.msra.mxu1 %v4570_v0 }
0x1057   :  { %v2793_v34 = vrot.slane %v2792_v43, 4  ;;  %v2801_v36 = vadd.f32 %v2800_v33, %v2799_v44 }
0x1059   :  { %v2794_v37 = vadd.f32 %v2793_v34, %v2792_v43  ;;  %v2802_v39 = vrot.slane %v2801_v36, 4 }
0x105b   :  { %v2795_v40 = vrot.slane %v2794_v37, 2  ;;  %v2803_v41 = vadd.f32 %v2802_v39, %v2801_v36 }
0x105d   :  { %v2796_v42 = vadd.f32 %v2795_v40, %v2794_v37  ;;  %v2804_v45 = vrot.slane %v2803_v41, 2 }
0x105f   :  { %v2797_v49 = vrot.slane %v2796_v42, 1  ;;  %v2805_v50 = vadd.f32 %v2804_v45, %v2803_v41 }
0x1061   :  { %v2806_v52 = vrot.slane %v2805_v50, 1  ;;  %v2798_v53 = vadd.f32 %v2797_v49, %v2796_v42 }
0x1063   :  { %v2807_v54 = vadd.f32 %v2806_v52, %v2805_v50 }
0x1065   :  { %v2808_v55 = vsel %vm515_vm5, %v2798_v53, %v2807_v54 }
0x1066   :  { %2814 = vrot.lane.b32.xlu1 %v2808_v55, %s4683_s2  ;;  %2810 = vrot.lane.b32.xlu0 %v2808_v55, %s4684_s30 }
0x106a   :  { %2822 = vrot.lane.b32.xlu1 %v2808_v55, %s4682_s27  ;;  %2818 = vrot.lane.b32.xlu0 %v2808_v55, %s4685_s5 }
0x106e   :  { %2830 = vrot.lane.b32.xlu1 %v2808_v55, %s4679_s25  ;;  %2826 = vrot.lane.b32.xlu0 %v2808_v55, %s4681_s26 }
0x1072   :  { %2834 = vrot.lane.b32.xlu0 %v2808_v55, %s4678_s24 }
0x10d8   :  { %v2815_v56 = vpop.permute.xlu1 %2814  ;;  %v2811_v58 = vpop.permute.xlu0 %2810 }
0x10d9   :  { %v2813_v59 = vadd.f32 %v2811_v58, %v2808_v55  ;;  %v4554_v55 = vld [vmem:[%s5373_s1 + $0x180] sm:$0xff]   ;;  %v4560_v58 = vld [vmem:[%s5373_s1 + $0x1b0] sm:$0xff]  }
0x10db   :  { %v2817_v60 = vadd.f32 %v2815_v56, %v2813_v59  ;;  %v4559_v56 = vld [vmem:[%s5373_s1 + $0x1a8] sm:$0xff]   ;;  %v4561_v59 = vld [vmem:[%s5373_s1 + $0x1b8] sm:$0xff]  }
0x10dc   :  { %v2823_v61 = vpop.permute.xlu1 %2822  ;;  %v2819_v62 = vpop.permute.xlu0 %2818 }
0x10dd   :  { %v2821_v63 = vadd.f32 %v2819_v62, %v2817_v60  ;;  %v4562_v60 = vld [vmem:[%s5373_s1 + $0x1c0] sm:$0xff]  }
0x10de   :  { %v4572_v62 = vld [vmem:[%s5373_s1 + $0x1e0] sm:$0xff]  }
0x10df   :  { %v2825_v1 = vadd.f32 %v2823_v61, %v2821_v63  ;;  %v4571_v61 = vld [vmem:[%s5373_s1 + $0x220] sm:$0xff]  }
0x10e0   :  { %v2827_v2 = vpop.permute.xlu0 %2826  ;;  %v2831_v4 = vpop.permute.xlu1 %2830  ;;  %v4573_v63 = vld [vmem:[%s5373_s1 + $0x2c0] sm:$0xff]   ;;  %4031 = vmatprep.subr.bf16.mxu1 %v4571_v61 }
0x10e1   :  { %v2829_v3 = vadd.f32 %v2827_v2, %v2825_v1  ;;  %v4574_v1 = vld [vmem:[%s5373_s1 + $0x280] sm:$0xff]   ;;  %4032 = vmatpush3.bf16.msra.mxu1 %v4572_v62  ;;  %v4575_v2 = vld [vmem:[%s5373_s1 + $0x218] sm:$0xff]  }
0x10e2   :  { %4033 = vmatprep.subr.bf16.mxu1 %v4575_v2 }
0x10e3   :  { %v2833_v6 = vadd.f32 %v2831_v4, %v2829_v3  ;;  %v4576_v3 = vld [vmem:[%s5373_s1 + $0x1d8] sm:$0xff]  }
0x10e4   :  { %v2835_v8 = vpop.permute.xlu0 %2834  ;;  %v4577_v4 = vld [vmem:[%s5373_s1 + $0x2b8] sm:$0xff]  }
0x10e5   :  { %v2837_v9 = vadd.f32 %v2835_v8, %v2833_v6  ;;  %v4578_v6 = vld [vmem:[%s5373_s1 + $0x278] sm:$0xff]   ;;  %4034 = vmatpush3.bf16.msra.mxu1 %v4576_v3  ;;  %v4579_v8 = vld [vmem:[%s5373_s1 + $0x210] sm:$0xff]  }
0x10e6   :  { %4035 = vmatprep.subr.bf16.mxu1 %v4579_v8 }
0x10e7   :  { %v2838_v10 = vmul.f32 0.0078125, %v2837_v9  ;;  %v4580_v9 = vld [vmem:[%s5373_s1 + $0x1d0] sm:$0xff]  }
0x10e9   :  { %v2839_v11 = vmul.f32 %v2838_v10, %v2838_v10  ;;  %4036 = vmatpush3.bf16.msra.mxu1 %v4580_v9 }
0x10eb   :  { %v2841_v12 = vrot.slane %v2839_v11, 7  ;;  %v4582_v11 = vld [vmem:[%s5373_s1 + $0x270] sm:$0xff]  }
0x10ed   :  { %v2843_v13 = vsub.f32 %v2838_v10, %v2841_v12  ;;  %v4583_v12 = vld [vmem:[%s5373_s1 + $0x208] sm:$0xff]  }
0x10ee   :  { %4037 = vmatprep.subr.bf16.mxu1 %v4583_v12  ;;  %v3203_v12 = vld [vmem:[%s5375_s3 + $0x90] ss:$0 sm:$0xff]  ;;  %s4689_s3 = smov [#allocation5]  }
0x10ef   :  { %v2844_v14 = vadd.f32 1e-05, %v2843_v13  ;;  %v4584_v13 = vld [vmem:[%s5373_s1 + $0x1c8] sm:$0xff]   ;;  %s3624_s17 = sshll.u32 %s4689_s3, 4  ;;  %s3625_s17 = int_to_ptr.vmem [resolvable:$true] %s3624_s17 }
0x10f0   :  { %4038 = vmatpush3.bf16.msra.mxu1 %v4584_v13  ;;  %s4651_s20 = scalar_lea.vmem %s3625_s17, 512  ;;  %p4656_p6 = scmp.lt.s32.totalorder %s3625_s17, %s3625_s17 }
0x10f1   :  { %4613 = vrsqrt.f32 %v2844_v14  ;;  %v4585_v14 = vld [vmem:[%s5373_s1 + $0x2a8] sm:$0xff]   ;;  %p4652_p5 = scmp.ne.s32.totalorder %s3625_s17, %s4651_s20  ;;  %p4657_p7 = scmp.lt.s32.totalorder %s4651_s20, %s4651_s20 }
0x10f3   :  { %p4658_p8 = por %p4657_p7, %p4656_p6 }
0x10f5   :  { %p4659_p9 = pnand %p4658_p8, %p4652_p5 }
0x10fe   :  { %v4614_v15 = vpop.eup %4613 }
0x10ff   :  { %v2847_v19 = vrot.slane %v4614_v15, 1  ;;  %v4586_v15 = vld [vmem:[%s5373_s1 + $0x268] sm:$0xff]  }
0x1101   :  { %v2849_v20 = vmul.f32 %v2847_v19, %v2791_v17  ;;  %v4588_v19 = vld [vmem:[%s5373_s1 + $0x2a0] sm:$0xff]  }
0x1103   :  { %v2850_v21 = vmul.f32 %v2849_v20, %v2838_v10  ;;  %v4581_v10 = vld [vmem:[%s5373_s1 + $0x2b0] sm:$0xff]  }
0x1105   :  { %v2852_v22 = vrot.slane %v2850_v21, 7  ;;  %v4591_v21 = vld [vmem:[%s5373_s1 + $0x298] sm:$0xff]  }
0x1107   :  { %v2854_v23 = vsub.f32 %v2791_v17, %v2852_v22  ;;  %v4587_v17 = vld [vmem:[%s5373_s1 + $0x300] sm:$0xff]   ;;  %v4592_v22 = vld [vmem:[%s5373_s1 + $0x258] sm:$0xff]  }
0x1108   :  { %4221 = vmatprep.subr.bf16.mxu1 %v4587_v17 }
0x1109   :  { %v2855_v24 = vsel %vm515_vm5, %v2849_v20, %v2854_v23  ;;  %v4589_v20 = vld [vmem:[%s5373_s1 + $0x260] sm:$0xff]   ;;  %v4594_v23 = vld [vmem:[%s5373_s1 + $0x290] sm:$0xff]  }
0x110a   :  { %2860 = vrot.lane.b32.xlu0 %v2855_v24, %s4679_s25  ;;  %2857 = vrot.lane.b32.xlu1 %v2855_v24, %s4678_s24 }
0x110e   :  { %2866 = vrot.lane.b32.xlu0 %v2855_v24, %s4682_s27  ;;  %2863 = vrot.lane.b32.xlu1 %v2855_v24, %s4681_s26 }
0x1112   :  { %2872 = vrot.lane.b32.xlu0 %v2855_v24, %s4683_s2  ;;  %2869 = vrot.lane.b32.xlu1 %v2855_v24, %s4685_s5 }
0x1116   :  { %2875 = vrot.lane.b32.xlu1 %v2855_v24, %s4684_s30 }
0x117c   :  { %v2861_v31 = vpop.permute.xlu0 %2860  ;;  %v2858_v32 = vpop.permute.xlu1 %2857 }
0x117d   :  { %v2878_v48 = vsel %vm317_vm1, %v2855_v24, %v2858_v32  ;;  %v4595_v24 = vld [vmem:[%s5373_s1 + $0x250] sm:$0xff]  }
0x117e   :  { %v2879_v51 = vsel %vm109_vm0, %v2878_v48, %v2861_v31 }
0x1180   :  { %v2867_v29 = vpop.permute.xlu0 %2866  ;;  %v2864_v47 = vpop.permute.xlu1 %2863 }
0x1181   :  { %v2880_v16 = vsel %vm326_vm2, %v2879_v51, %v2864_v47  ;;  %v4590_v51 = vld [vmem:[%s5373_s1 + $0x2f8] sm:$0xff]  }
0x1182   :  { %v2881_v44 = vsel %vm331_vm3, %v2880_v16, %v2867_v29 }
0x1184   :  { %v2870_v43 = vpop.permute.xlu1 %2869  ;;  %v2873_v33 = vpop.permute.xlu0 %2872 }
0x1185   :  { %v2882_v34 = vsel %vm410_vm4, %v2881_v44, %v2870_v43  ;;  %v4593_v43 = vld [vmem:[%s5373_s1 + $0x2f0] sm:$0xff]  }
0x1186   :  { %v2883_v36 = vsel %vm622_vm6, %v2882_v34, %v2873_v33 }
0x1188   :  { %v2876_v37 = vpop.permute.xlu1 %2875 }
0x1189   :  { %v2884_v39 = vsel %vm624_vm7, %v2883_v36, %v2876_v37  ;;  %v4596_v37 = vld [vmem:[%s5373_s1 + $0x2e8] sm:$0xff]  }
0x118a   :  { %v2888_v40 = vrot.slane %v2884_v39, %v4814_v35  ;;  %v2894_v45 = vrot.slane %v2884_v39, %v4819_v38  ;;  %v4555_v35 = vld [vmem:[%s5373_s1 + $0x188] sm:$0xff]   ;;  %v4556_v38 = vld [vmem:[%s5373_s1 + $0x190] sm:$0xff]  }
0x118c   :  { %v2889_v41 = vmul.f32 %v2888_v40, %v5159_v18  ;;  %v2890_v42 = vmul.f32 %v2888_v40, %v5161_v46  ;;  %v4557_v18 = vld [vmem:[%s5373_s1 + $0x198] sm:$0xff]   ;;  %v4558_v46 = vld [vmem:[%s5373_s1 + $0x1a0] sm:$0xff]  }
0x118e   :  { %v2895_v49 = vadd.f32 %v2894_v45, %v2889_v41  ;;  %v2896_v50 = vadd.f32 %v2894_v45, %v2890_v42  ;;  %v4599_v41 = vld [vmem:[%s5373_s1 + $0x2e0] sm:$0xff]  }
0x1190   :  { %v2897_v52 = vmax.f32 %v2895_v49, 0.0  ;;  %v2898_v53 = vmax.f32 %v2896_v50, 0.0  ;;  %v4600_v50 = vld [vmem:[%s5373_s1 + $0x2d8] sm:$0xff]  }
0x1192   :  { %v2899_v54 = vpack.c.bf16 %v2898_v53, %v2897_v52 }
0x1194   :  { %4199 = vmatprep.subr.bf16.mxu0 %v2899_v54 }
0x1195   :  { %4200 = vmatpush3.bf16.msra.mxu0 %v2899_v54 }
0x1196   :  { %4051 = vmatprep.subr.bf16.mxu0 %v4573_v63 }
0x1198   :  { %4202 = vmatmul.mubr.msk.bf16.vlgmr.msra.gmra.mxu0 %vm317_vm1, %v4554_v55  ;;  %v4601_v55 = vld [vmem:[%s5373_s1 + $0x2d0] sm:$0xff]  }
0x1199   :  { %4205 = vmatprep.mubr.msk.bf16.mxu0 %vm317_vm1, %v4555_v35  ;;  %4052 = vmatpush3.bf16.msra.mxu0 %v4574_v1 }
0x119a   :  { %4053 = vmatprep.subr.bf16.mxu0 %v4577_v4 }
0x119d   :  { %4054 = vmatpush3.bf16.msra.mxu0 %v4578_v6 }
0x119e   :  { %4055 = vmatprep.subr.bf16.mxu0 %v4581_v10 }
0x11a0   :  { %4206 = vmatmul.mubr.msk.bf16.gmra.mxu0 %vm317_vm1, %v4556_v38 }
0x11a1   :  { %4209 = vmatprep.mubr.msk.bf16.mxu0 %vm317_vm1, %v4557_v18  ;;  %4056 = vmatpush3.bf16.msra.mxu0 %v4582_v11 }
0x11a2   :  { %4057 = vmatprep.subr.bf16.mxu0 %v4585_v14 }
0x11a5   :  { %4058 = vmatpush3.bf16.msra.mxu0 %v4586_v15 }
0x11a6   :  { %4059 = vmatprep.subr.bf16.mxu0 %v4588_v19 }
0x11a8   :  { %4210 = vmatmul.mubr.msk.bf16.gmra.mxu0 %vm317_vm1, %v4558_v46 }
0x11a9   :  { %4213 = vmatprep.mubr.msk.bf16.mxu0 %vm317_vm1, %v4559_v56  ;;  %4060 = vmatpush3.bf16.msra.mxu0 %v4589_v20  ;;  %v4602_v56 = vld [vmem:[%s5373_s1 + $0x2c8] sm:$0xff]  }
0x11aa   :  { %4061 = vmatprep.subr.bf16.mxu0 %v4591_v21 }
0x11ad   :  { %4062 = vmatpush3.bf16.msra.mxu0 %v4592_v22 }
0x11ae   :  { %4063 = vmatprep.subr.bf16.mxu0 %v4594_v23 }
0x11b0   :  { %4214 = vmatmul.mubr.msk.bf16.gmra.mxu0 %vm317_vm1, %v4560_v58 }
0x11b1   :  { %4217 = vmatprep.mubr.msk.bf16.mxu0 %vm317_vm1, %v4561_v59  ;;  %4064 = vmatpush3.bf16.msra.mxu0 %v4595_v24 }
0x11b2   :  { %4065 = vmatprep.subr.bf16.mxu0 %v4597_v25 }
0x11b5   :  { %4066 = vmatpush3.bf16.msra.mxu0 %v4598_v26 }
0x11b8   :  { %4218 = vmatmul.mubr.msk.bf16.gmra.mxu0 %vm317_vm1, %v4562_v60 }
0x1258   :  { %v4203_v27 = vpop.f32.mrf.mxu0 }
0x125a   :  { %v3034_v5 = vpop.f32.mrf.mxu0 }
0x125c   :  { %v4204_v57 = vpop.f32.mrf.mxu0 }
0x125d   :  { %v3118_v34 = vpack.c.bf16 %v4204_v57, %v4203_v27 }
0x125e   :  { %v3037_v28 = vpop.f32.mrf.mxu0 }
0x125f   :  { %v3113_v48 = vpack.c.bf16 %v3037_v28, %v3034_v5 }
0x1260   :  { %v4207_v7 = vpop.f32.mrf.mxu0 }
0x1262   :  { %v3050_v30 = vpop.f32.mrf.mxu0 }
0x1264   :  { %v4208_v0 = vpop.f32.mrf.mxu0 }
0x1265   :  { %v3119_v47 = vpack.c.bf16 %v4208_v0, %v4207_v7 }
0x1266   :  { %v3053_v31 = vpop.f32.mrf.mxu0 }
0x1267   :  { %v3114_v32 = vpack.c.bf16 %v3053_v31, %v3050_v30 }
0x1268   :  { %v4211_v29 = vpop.f32.mrf.mxu0 }
0x1269   :  { %3476 = vmatprep.mubr.bf16.mxu1 %v3114_v32 }
0x126a   :  { %v3066_v16 = vpop.f32.mrf.mxu0  ;;  %3477 = vmatmul.mubr.bf16.vlgmr.msra.gmra.mxu1 %v3113_v48 }
0x126b   :  { %4222 = vmatpush3.bf16.msra.mxu1 %v4587_v17  ;;  %3484 = vmatprep.mubr.bf16.mxu1 %v3119_v47 }
0x126c   :  { %v4212_v44 = vpop.f32.mrf.mxu0  ;;  %4223 = vmatprep.subr.bf16.mxu1 %v4590_v51 }
0x126d   :  { %v3120_v46 = vpack.c.bf16 %v4212_v44, %v4211_v29 }
0x126e   :  { %v3069_v33 = vpop.f32.mrf.mxu0 }
0x126f   :  { %4224 = vmatpush3.bf16.msra.mxu1 %v4590_v51  ;;  %v3115_v49 = vpack.c.bf16 %v3069_v33, %v3066_v16 }
0x1270   :  { %v4215_v36 = vpop.f32.mrf.mxu0  ;;  %4225 = vmatprep.subr.bf16.mxu1 %v4593_v43 }
0x1272   :  { %v3082_v39 = vpop.f32.mrf.mxu0  ;;  %3485 = vmatmul.mubr.bf16.gmra.mxu1 %v3118_v34 }
0x1273   :  { %4226 = vmatpush3.bf16.msra.mxu1 %v4593_v43 }
0x1274   :  { %v4216_v40 = vpop.f32.mrf.mxu0  ;;  %4227 = vmatprep.subr.bf16.mxu1 %v4596_v37 }
0x1275   :  { %v3121_v53 = vpack.c.bf16 %v4216_v40, %v4215_v36 }
0x1276   :  { %v3085_v42 = vpop.f32.mrf.mxu0 }
0x1277   :  { %v3116_v45 = vpack.c.bf16 %v3085_v42, %v3082_v39  ;;  %4228 = vmatpush3.bf16.msra.mxu1 %v4596_v37 }
0x1278   :  { %4229 = vmatprep.subr.bf16.mxu1 %v4599_v41  ;;  %v4219_v52 = vpop.f32.mrf.mxu0 }
0x1279   :  { %3525 = vmatprep.mubr.bf16.mxu0 %v3116_v45 }
0x127a   :  { %3526 = vmatmul.mubr.bf16.vlgmr.msra.gmra.mxu0 %v3115_v49  ;;  %v3098_v54 = vpop.f32.mrf.mxu0 }
0x127b   :  { %4230 = vmatpush3.bf16.msra.mxu1 %v4599_v41  ;;  %3533 = vmatprep.mubr.bf16.mxu0 %v3121_v53 }
0x127c   :  { %4231 = vmatprep.subr.bf16.mxu1 %v4600_v50  ;;  %v4220_v35 = vpop.f32.mrf.mxu0 }
0x127d   :  { %v3122_v58 = vpack.c.bf16 %v4220_v35, %v4219_v52 }
0x127e   :  { %v3101_v38 = vpop.f32.mrf.mxu0 }
0x127f   :  { %4232 = vmatpush3.bf16.msra.mxu1 %v4600_v50  ;;  %v3117_v18 = vpack.c.bf16 %v3101_v38, %v3098_v54 }
0x1280   :  { %4233 = vmatprep.subr.bf16.mxu1 %v4601_v55 }
0x1281   :  { %4237 = vmatprep.mubr.bf16.mxu1 %v3117_v18 }
0x1282   :  { %3534 = vmatmul.mubr.bf16.gmra.mxu0 %v3120_v46 }
0x1283   :  { %4234 = vmatpush3.bf16.msra.mxu1 %v4601_v55 }
0x1284   :  { %4235 = vmatprep.subr.bf16.mxu1 %v4602_v56 }
0x1287   :  { %4236 = vmatpush3.bf16.msra.mxu1 %v4602_v56 }
0x128a   :  { %4238 = vmatmul.mubr.bf16.vlgmr.msra.gmra.mxu1 %v3122_v58 }
0x132a   :  { %v4039_v59 = vpop.f32.mrf.mxu1 }
0x132c   :  { %v4040_v60 = vpop.f32.mrf.mxu1 }
0x132d   :  { %v4041_v14 = vadd.f32 %v4040_v60, %v4039_v59 }
0x132e   :  { %v4042_v61 = vpop.f32.mrf.mxu1 }
0x132f   :  { %v3479_v24 = vadd.f32 %v4041_v14, %v3203_v12 }
0x1330   :  { %v4043_v62 = vpop.f32.mrf.mxu1 }
0x1331   :  { %v4044_v25 = vadd.f32 %v4043_v62, %v4042_v61 }
0x1332   :  { %v4045_v63 = vpop.f32.mrf.mxu1 }
0x1333   :  { %v3482_v31 = vadd.f32 %v4044_v25, %v3203_v12 }
0x1334   :  { %v4046_v1 = vpop.f32.mrf.mxu1 }
0x1335   :  { %v4047_v9 = vadd.f32 %v4046_v1, %v4045_v63 }
0x1336   :  { %v4048_v4 = vpop.f32.mrf.mxu1 }
0x1337   :  { %v3487_v15 = vadd.f32 %v4047_v9, %v3203_v12 }
0x1338   :  { %v4049_v10 = vpop.f32.mrf.mxu1 }
0x1339   :  { %v4050_v17 = vadd.f32 %v4049_v10, %v4048_v4 }
0x133a   :  { %v4067_v2 = vpop.f32.mrf.mxu0 }
0x133b   :  { %v3490_v26 = vadd.f32 %v4050_v17, %v3203_v12 }
0x133c   :  { %v4068_v3 = vpop.f32.mrf.mxu0 }
0x133d   :  { %v4069_v21 = vadd.f32 %v4068_v3, %v4067_v2 }
0x133e   :  { %v4070_v6 = vpop.f32.mrf.mxu0 }
0x133f   :  { %v3528_v7 = vadd.f32 %v4069_v21, %v3479_v24 }
0x1340   :  { %v4071_v8 = vpop.f32.mrf.mxu0 }
0x1341   :  { %v4072_v57 = vadd.f32 %v4071_v8, %v4070_v6 }
0x1342   :  { %v4073_v11 = vpop.f32.mrf.mxu0 }
0x1343   :  { %v3531_v16 = vadd.f32 %v4072_v57, %v3482_v31 }
0x1344   :  { %v4074_v13 = vpop.f32.mrf.mxu0 }
0x1345   :  { %v4075_v19 = vadd.f32 %v4074_v13, %v4073_v11 }
0x1346   :  { %v4076_v20 = vpop.f32.mrf.mxu0 }
0x1347   :  { %v3536_v22 = vadd.f32 %v4075_v19, %v3487_v15 }
0x1348   :  { %v4077_v23 = vpop.f32.mrf.mxu0 }
0x1349   :  { %v4078_v27 = vadd.f32 %v4077_v23, %v4076_v20 }
0x134a   :  { %v4239_v5 = vpop.f32.mrf.mxu1 }
0x134b   :  { %v3585_v28 = vadd.f32 %v4239_v5, %v3536_v22  ;;  %v3539_v30 = vadd.f32 %v4078_v27, %v3490_v26 }
0x134c   :  { %v3576_v0 = vpop.f32.mrf.mxu1 }
0x134d   :  { %v3920_v32 = vmul.f32 -1.442695, %v3585_v28  ;;  %v3577_v48 = vadd.f32 %v3576_v0, %v3528_v7 }
0x134e   :  { %v4240_v29 = vpop.f32.mrf.mxu1 }
0x134f   :  { %4615 = vpow2.f32 %v3920_v32  ;;  %v3918_v51 = vmul.f32 -1.442695, %v3577_v48  ;;  %v3588_v47 = vadd.f32 %v4240_v29, %v3539_v30 }
0x1350   :  { %v3579_v44 = vpop.f32.mrf.mxu1 }
0x1351   :  { %4617 = vpow2.f32 %v3918_v51  ;;  %v3921_v43 = vmul.f32 -1.442695, %v3588_v47  ;;  %v3580_v33 = vadd.f32 %v3579_v44, %v3531_v16 }
0x1353   :  { %4619 = vpow2.f32 %v3921_v43  ;;  %v3919_v34 = vmul.f32 -1.442695, %v3580_v33 }
0x1355   :  { %4621 = vpow2.f32 %v3919_v34 }
0x135c   :  { %v4616_v36 = vpop.eup %4615 }
0x135d   :  { %v3605_v37 = vadd.f32 1.0, %v4616_v36 }
0x135e   :  { %v4618_v39 = vpop.eup %4617 }
0x135f   :  { %4623 = vrcp.f32 %v3605_v37  ;;  %v3603_v40 = vadd.f32 1.0, %v4618_v39 }
0x1360   :  { %v4620_v41 = vpop.eup %4619 }
0x1361   :  { %4625 = vrcp.f32 %v3603_v40  ;;  %v3606_v42 = vadd.f32 1.0, %v4620_v41 }
0x1362   :  { %v4622_v45 = vpop.eup %4621 }
0x1363   :  { %4627 = vrcp.f32 %v3606_v42  ;;  %v3604_v49 = vadd.f32 1.0, %v4622_v45 }
0x1365   :  { %4629 = vrcp.f32 %v3604_v49 }
0x136c   :  { %v4624_v50 = vpop.eup %4623 }
0x136d   :  { %3617 = vst.msk [vmem:[#allocation5 + $0x10] sm:$0xff] %vm317_vm1, %v4624_v50 }
0x136e   :  { %v4626_v52 = vpop.eup %4625 }
0x136f   :  { %3615 = vst.msk [vmem:[#allocation5] sm:$0xff] %vm317_vm1, %v4626_v52 }
0x1370   :  { %v4628_v53 = vpop.eup %4627 }
0x1371   :  { %3618 = vst.msk [vmem:[#allocation5 + $0x18] sm:$0xff] %vm317_vm1, %v4628_v53 }
0x1372   :  { %v4630_v54 = vpop.eup %4629 }
0x1373   :  { %3616 = vst.msk [vmem:[#allocation5 + $0x8] sm:$0xff] %vm317_vm1, %v4630_v54 }
0x1374   :  { %4662 = shalt.err (!%p4659_p9)
}
0x1375   :  { %3630 = dma.vmem_to_hbm [thread:$0]  %s3625_s17, 512, %s5376_s4, [#allocation4], %s4676_s18, %s4676_s18, %s4677_s19  }
0x1376   :  { %4673 = dma.done.wait [#allocation4], 512  }
0x1377   :  { %4674 = vsyncadd [#allocation4], 4294966784 }
0x1378   :  { %3634 = vsyncpa [#allocation3], 1 }
0x1379   :  { %3635 = vsyncpa [#allocation4], 1 }

</bundles_post_ra>
